<compile_context>
chip_gen: v6e
topology: v6e:2x2x1
jax: 0.10.0
libtpu: 0.0.40
codegen_flags: <defaults>
</compile_context>

<pallas_src>
import functools

import jax
import jax.numpy as jnp
from jax.experimental import pallas as pl
from jax.experimental.pallas import tpu as pltpu

# Logical (PyTorch) sizes.
IN_FEATURES = 28 * 28      # 784
HIDDEN1 = 300
HIDDEN2 = 100
NUM_CLASSES = 10

# Lane-padded sizes (multiples of 128).
D_IN = 896
D_H1 = 384
D_H2 = 128
D_OUT = 128


def fc1_kernel(x_ref, w1_ref, b1_ref, w2_ref, b2_ref, w3_ref, b3_ref, o_ref):
    # x_ref: (TILE_B, D_IN) bf16; weights bf16; biases f32.
    x = x_ref[...]
    h1 = jnp.dot(x, w1_ref[...], preferred_element_type=jnp.float32) + b1_ref[...]
    h1 = jnp.maximum(h1, 0.0).astype(jnp.bfloat16)          # ReLU in f32, cast for MXU
    h2 = jnp.dot(h1, w2_ref[...], preferred_element_type=jnp.float32) + b2_ref[...]
    h2 = jnp.maximum(h2, 0.0).astype(jnp.bfloat16)
    out = jnp.dot(h2, w3_ref[...], preferred_element_type=jnp.float32) + b3_ref[...]
    o_ref[...] = out.astype(o_ref.dtype)                     # lane-dense (TILE_B, 128) store


def _pad_to(a, shape):
    return jnp.pad(a, [(0, t - s) for s, t in zip(a.shape, shape)])


@functools.partial(jax.jit, static_argnames=("tile_b",))
def fc1_forward(x, params, *, tile_b=128):
    w1, b1, w2, b2, w3, b3 = params
    B = x.shape[0]

    # Glue: torch.flatten(x, 1)
    x2d = x.reshape(B, -1).astype(jnp.float32)

    # Zero-pad batch to a tile multiple and features to lane multiples; bf16 operands.
    n_tiles = pl.cdiv(B, tile_b)
    Bp = n_tiles * tile_b
    xp = _pad_to(x2d, (Bp, D_IN)).astype(jnp.bfloat16)
    w1p = _pad_to(w1, (D_IN, D_H1)).astype(jnp.bfloat16)
    w2p = _pad_to(w2, (D_H1, D_H2)).astype(jnp.bfloat16)
    w3p = _pad_to(w3, (D_H2, D_OUT)).astype(jnp.bfloat16)
    b1p = _pad_to(b1, (1, D_H1)).astype(jnp.float32)
    b2p = _pad_to(b2, (1, D_H2)).astype(jnp.float32)
    b3p = _pad_to(b3, (1, D_OUT)).astype(jnp.float32)

    # Weights/biases: constant index_map -> VMEM-resident across batch tiles.
    const2d = lambda shape: pl.BlockSpec(shape, lambda i: (0, 0))
    in_specs = [
        pl.BlockSpec((tile_b, D_IN), lambda i: (i, 0)),   # x tile, varies with grid
        const2d((D_IN, D_H1)), const2d((1, D_H1)),
        const2d((D_H1, D_H2)), const2d((1, D_H2)),
        const2d((D_H2, D_OUT)), const2d((1, D_OUT)),
    ]
    out_specs = pl.BlockSpec((tile_b, D_OUT), lambda i: (i, 0))

    flops = 2 * B * (IN_FEATURES * HIDDEN1 + HIDDEN1 * HIDDEN2 + HIDDEN2 * NUM_CLASSES)
    bytes_accessed = (
        xp.size * 2                                        # bf16 activations in
        + (w1p.size + w2p.size + w3p.size) * 2             # bf16 weights
        + (b1p.size + b2p.size + b3p.size) * 4             # f32 biases
        + Bp * D_OUT * 4                                   # f32 output
    )

    out_padded = pl.pallas_call(
        fc1_kernel,
        out_shape=jax.ShapeDtypeStruct((Bp, D_OUT), jnp.float32),
        grid=(n_tiles,),
        in_specs=in_specs,
        out_specs=out_specs,
        compiler_params=pltpu.CompilerParams(
            dimension_semantics=("parallel",),             # megacore on v7x
            vmem_limit_bytes=32 * 1024 * 1024,             # safe on v5e/v6e/v7x
        ),
        cost_estimate=pl.CostEstimate(
            flops=flops, transcendentals=0, bytes_accessed=bytes_accessed),
    )(xp, w1p, b1p, w2p, b2p, w3p, b3p)

    # Strip batch + class padding.
    return out_padded[:B, :NUM_CLASSES]


def init_params(key):
    # Deterministic synthetic init (PyTorch-Linear-like uniform fan-in scaling).
    sizes = [(IN_FEATURES, HIDDEN1), (HIDDEN1, HIDDEN2), (HIDDEN2, NUM_CLASSES)]
    params = []
    for fan_in, fan_out in sizes:
        kw, kb, key = jax.random.split(key, 3)
        bound = 1.0 / jnp.sqrt(fan_in)
        w = jax.random.uniform(kw, (fan_in, fan_out), jnp.float32, -bound, bound)
        b = jax.random.uniform(kb, (1, fan_out), jnp.float32, -bound, bound)
        params += [w, b]
    return params


if __name__ == "__main__":
    key = jax.random.PRNGKey(0)
    kx, kp = jax.random.split(key)

    # Deliberately a non-multiple of the batch tile (200 -> padded to 256, grid=2)
    # to exercise both the batch-tiled grid and the padding/slicing path.
    B = 200
    x = jax.random.normal(kx, (B, 1, 28, 28), dtype=jnp.float32)
    params = init_params(kp)

    out = fc1_forward(x, params, tile_b=128)
    jax.block_until_ready(out)

    # Sanity check against plain-JAX f32 reference (bf16 matmuls -> loose tolerance).
    w1, b1, w2, b2, w3, b3 = params
    xf = x.reshape(B, -1)
    ref = jnp.maximum(xf @ w1 + b1, 0.0)
    ref = jnp.maximum(ref @ w2 + b2, 0.0)
    ref = ref @ w3 + b3

    assert out.shape == (B, NUM_CLASSES)
    assert jnp.allclose(out, ref, atol=5e-2, rtol=5e-2), (
        float(jnp.max(jnp.abs(out - ref))))
    print("KERNEL_OK")
</pallas_src>

<mosaic_0001>
module attributes {stable_mosaic.version = 11 : i64} {
  func.func @fc1_kernel(%arg0: i32, %arg1: memref<128x896xbf16, #tpu.memory_space<vmem>>, %arg2: memref<896x384xbf16, #tpu.memory_space<vmem>>, %arg3: memref<1x384xf32, #tpu.memory_space<vmem>>, %arg4: memref<384x128xbf16, #tpu.memory_space<vmem>>, %arg5: memref<1x128xf32, #tpu.memory_space<vmem>>, %arg6: memref<128x128xbf16, #tpu.memory_space<vmem>>, %arg7: memref<1x128xf32, #tpu.memory_space<vmem>>, %arg8: memref<128x128xf32, #tpu.memory_space<vmem>>) attributes {dimension_semantics = [#tpu.dimension_semantics<parallel>], iteration_bounds = array<i64: 2>, scalar_prefetch = 0 : i64, scratch_operands = 0 : i64, tpu.core_type = #tpu.core_type<tc>, window_params = [{transform_indices = @transform_0, window_bounds = array<i64: 128, 896>}, {pipeline_mode = #tpu.pipeline_mode<synchronous>, transform_indices = @transform_1, window_bounds = array<i64: 896, 384>}, {pipeline_mode = #tpu.pipeline_mode<synchronous>, transform_indices = @transform_2, window_bounds = array<i64: 1, 384>}, {pipeline_mode = #tpu.pipeline_mode<synchronous>, transform_indices = @transform_3, window_bounds = array<i64: 384, 128>}, {pipeline_mode = #tpu.pipeline_mode<synchronous>, transform_indices = @transform_4, window_bounds = array<i64: 1, 128>}, {pipeline_mode = #tpu.pipeline_mode<synchronous>, transform_indices = @transform_5, window_bounds = array<i64: 128, 128>}, {pipeline_mode = #tpu.pipeline_mode<synchronous>, transform_indices = @transform_6, window_bounds = array<i64: 1, 128>}, {transform_indices = @transform_7, window_bounds = array<i64: 128, 128>}]} {
    %c0 = arith.constant 0 : index
    %c0_0 = arith.constant 0 : index
    %0 = vector.load %arg1[%c0, %c0_0] : memref<128x896xbf16, #tpu.memory_space<vmem>>, vector<128x896xbf16>
    %c0_1 = arith.constant 0 : index
    %c0_2 = arith.constant 0 : index
    %1 = vector.load %arg2[%c0_1, %c0_2] : memref<896x384xbf16, #tpu.memory_space<vmem>>, vector<896x384xbf16>
    %cst = arith.constant dense<0.000000e+00> : vector<128x384xf32>
    %2 = tpu.matmul %0, %1, %cst {dimension_numbers = #tpu.dot_dimension_numbers<[1], [0], [0], [1], [0, 0, 1, 1], [], []>} : vector<128x896xbf16>, vector<896x384xbf16>, vector<128x384xf32> -> vector<128x384xf32>
    %c0_3 = arith.constant 0 : index
    %c0_4 = arith.constant 0 : index
    %3 = vector.load %arg3[%c0_3, %c0_4] : memref<1x384xf32, #tpu.memory_space<vmem>>, vector<1x384xf32>
    %4 = vector.broadcast %3 : vector<1x384xf32> to vector<128x384xf32>
    %5 = arith.addf %2, %4 : vector<128x384xf32>
    %cst_5 = arith.constant 0.000000e+00 : f32
    %6 = vector.broadcast %cst_5 : f32 to vector<128x384xf32>
    %7 = arith.maximumf %5, %6 : vector<128x384xf32>
    %8 = arith.truncf %7 : vector<128x384xf32> to vector<128x384xbf16>
    %c0_6 = arith.constant 0 : index
    %c0_7 = arith.constant 0 : index
    %9 = vector.load %arg4[%c0_6, %c0_7] : memref<384x128xbf16, #tpu.memory_space<vmem>>, vector<384x128xbf16>
    %cst_8 = arith.constant dense<0.000000e+00> : vector<128x128xf32>
    %10 = tpu.matmul %8, %9, %cst_8 {dimension_numbers = #tpu.dot_dimension_numbers<[1], [0], [0], [1], [0, 0, 1, 1], [], []>} : vector<128x384xbf16>, vector<384x128xbf16>, vector<128x128xf32> -> vector<128x128xf32>
    %c0_9 = arith.constant 0 : index
    %c0_10 = arith.constant 0 : index
    %11 = vector.load %arg5[%c0_9, %c0_10] : memref<1x128xf32, #tpu.memory_space<vmem>>, vector<1x128xf32>
    %12 = vector.broadcast %11 : vector<1x128xf32> to vector<128x128xf32>
    %13 = arith.addf %10, %12 : vector<128x128xf32>
    %cst_11 = arith.constant 0.000000e+00 : f32
    %14 = vector.broadcast %cst_11 : f32 to vector<128x128xf32>
    %15 = arith.maximumf %13, %14 : vector<128x128xf32>
    %16 = arith.truncf %15 : vector<128x128xf32> to vector<128x128xbf16>
    %c0_12 = arith.constant 0 : index
    %c0_13 = arith.constant 0 : index
    %17 = vector.load %arg6[%c0_12, %c0_13] : memref<128x128xbf16, #tpu.memory_space<vmem>>, vector<128x128xbf16>
    %cst_14 = arith.constant dense<0.000000e+00> : vector<128x128xf32>
    %18 = tpu.matmul %16, %17, %cst_14 {dimension_numbers = #tpu.dot_dimension_numbers<[1], [0], [0], [1], [0, 0, 1, 1], [], []>} : vector<128x128xbf16>, vector<128x128xbf16>, vector<128x128xf32> -> vector<128x128xf32>
    %c0_15 = arith.constant 0 : index
    %c0_16 = arith.constant 0 : index
    %19 = vector.load %arg7[%c0_15, %c0_16] : memref<1x128xf32, #tpu.memory_space<vmem>>, vector<1x128xf32>
    %20 = vector.broadcast %19 : vector<1x128xf32> to vector<128x128xf32>
    %21 = arith.addf %18, %20 : vector<128x128xf32>
    %c0_17 = arith.constant 0 : index
    %c0_18 = arith.constant 0 : index
    %22 = vector.load %arg8[%c0_17, %c0_18] : memref<128x128xf32, #tpu.memory_space<vmem>>, vector<128x128xf32>
    tpu.vector_store %arg8[%c0_17, %c0_18], %21 {strides = array<i32>} : memref<128x128xf32, #tpu.memory_space<vmem>>, vector<128x128xf32>,
    return
  }
  func.func @transform_0(%arg0: i32) -> (i32, i32) {
    %c0_i32 = arith.constant 0 : i32
    %c0_i32_0 = arith.constant 0 : i32
    return %arg0, %c0_i32 : i32, i32
  }
  func.func @transform_1(%arg0: i32) -> (i32, i32) {
    %c0_i32 = arith.constant 0 : i32
    %c0_i32_0 = arith.constant 0 : i32
    %c0_i32_1 = arith.constant 0 : i32
    return %c0_i32, %c0_i32_0 : i32, i32
  }
  func.func @transform_2(%arg0: i32) -> (i32, i32) {
    %c0_i32 = arith.constant 0 : i32
    %c0_i32_0 = arith.constant 0 : i32
    %c0_i32_1 = arith.constant 0 : i32
    return %c0_i32, %c0_i32_0 : i32, i32
  }
  func.func @transform_3(%arg0: i32) -> (i32, i32) {
    %c0_i32 = arith.constant 0 : i32
    %c0_i32_0 = arith.constant 0 : i32
    %c0_i32_1 = arith.constant 0 : i32
    return %c0_i32, %c0_i32_0 : i32, i32
  }
  func.func @transform_4(%arg0: i32) -> (i32, i32) {
    %c0_i32 = arith.constant 0 : i32
    %c0_i32_0 = arith.constant 0 : i32
    %c0_i32_1 = arith.constant 0 : i32
    return %c0_i32, %c0_i32_0 : i32, i32
  }
  func.func @transform_5(%arg0: i32) -> (i32, i32) {
    %c0_i32 = arith.constant 0 : i32
    %c0_i32_0 = arith.constant 0 : i32
    %c0_i32_1 = arith.constant 0 : i32
    return %c0_i32, %c0_i32_0 : i32, i32
  }
  func.func @transform_6(%arg0: i32) -> (i32, i32) {
    %c0_i32 = arith.constant 0 : i32
    %c0_i32_0 = arith.constant 0 : i32
    %c0_i32_1 = arith.constant 0 : i32
    return %c0_i32, %c0_i32_0 : i32, i32
  }
  func.func @transform_7(%arg0: i32) -> (i32, i32) {
    %c0_i32 = arith.constant 0 : i32
    %c0_i32_0 = arith.constant 0 : i32
    return %arg0, %c0_i32 : i32, i32
  }
}

</mosaic_0001>

<bundles_post_ra>
// kernel: fc1_forward.1
= control target key start
LH: loop header
LB: loop body
LE: loop exit
PB: predicated region body
PF: predicated region fallthrough
CT: control target
= control target key end

     0   :  { %s4436_s24 = smov 0   ;;  %s5698_s0 = inlined_call_operand.vmem [shape: bf16[256,896], index: 0, kind: input, shape index: {}]   ;;  %s5699_s1 = inlined_call_operand.vmem [shape: bf16[896,384], index: 1, kind: input, shape index: {}]   ;;  %s5700_s2 = inlined_call_operand.vmem [shape: f32[1,384], index: 2, kind: input, shape index: {}]   ;;  %s5701_s3 = inlined_call_operand.vmem [shape: bf16[384,128], index: 3, kind: input, shape index: {}]   ;;  %s5702_s4 = inlined_call_operand.vmem [shape: f32[1,128], index: 4, kind: input, shape index: {}]   ;;  %s5703_s5 = inlined_call_operand.vmem [shape: bf16[128,128], index: 5, kind: input, shape index: {}]   ;;  %s5704_s6 = inlined_call_operand.vmem [shape: f32[1,128], index: 6, kind: input, shape index: {}]   ;;  %s5705_s7 = inlined_call_operand.vmem [shape: f32[256,128], index: 7, kind: output, shape index: {}]  }
   0x1 LB: > { %s3344_s25 = sadd.s32 4294967295, %s4393_s24   ;;  %p3348_p0 = scmp.ge.s32.totalorder %s4393_s24, 1  ;;  %s4393_s24 = sphi %s4436_s24, %s17_s24  }
   0x2   : > { %p239_p1 = scmp.lt.s32.totalorder %s4393_s24, 3 }
   0x4   : > { %p240_p2 = pnand %p3348_p0, %p239_p1 }
   0x6   : > { %243 = sbr.rel (%p240_p2) target bundleno = 941 (0x3ad), region = 48 }
   0xb   : > { %v4039_v0 = vld [vmem:[%s5699_s1 + $0xac] ss:$12 sps:$4 sm:$0xff]   ;;  %v4041_v1 = vld [vmem:[%s5699_s1 + $0xa8] ss:$12 sps:$4 sm:$0xff]   ;;  %v4047_v5 = vld [vmem:[%s5699_s1 + $0x90] ss:$12 sps:$4 sm:$0xff]  }
   0xc   : > { %1775 = vmatprep.subr.bf16.mxu0 %v4039_v0  ;;  %v4042_v2 = vld [vmem:[%s5699_s1 + $0x22c] ss:$12 sps:$4 sm:$0xff]   ;;  %v4044_v3 = vld [vmem:[%s5699_s1 + $0x228] ss:$12 sps:$4 sm:$0xff]   ;;  %v4050_v7 = vld [vmem:[%s5699_s1 + $0x210] ss:$12 sps:$4 sm:$0xff]  }
   0xd   : > { %1776 = vmatpush1.bf16.msra.mxu0 %v4041_v1  ;;  %v4045_v4 = vld [vmem:[%s5699_s1 + $0x94] ss:$12 sps:$4 sm:$0xff]   ;;  %1888 = vmatprep.subr.bf16.mxu1 %v4042_v2  ;;  %v4051_v8 = vld [vmem:[%s5699_s1 + $0x7c] ss:$12 sps:$4 sm:$0xff]   ;;  %v4053_v9 = vld [vmem:[%s5699_s1 + $0x78] ss:$12 sps:$4 sm:$0xff]  }
   0xe   : > { %v4048_v6 = vld [vmem:[%s5699_s1 + $0x214] ss:$12 sps:$4 sm:$0xff]   ;;  %1889 = vmatpush1.bf16.msra.mxu1 %v4044_v3  ;;  %1777 = vmatprep.subr.bf16.mxu0 %v4045_v4  ;;  %v4054_v10 = vld [vmem:[%s5699_s1 + $0x1fc] ss:$12 sps:$4 sm:$0xff]   ;;  %v4057_v11 = vld [vmem:[%s5699_s1 + $0x64] ss:$12 sps:$4 sm:$0xff]  }
   0xf   : > { %1890 = vmatprep.subr.bf16.mxu1 %v4048_v6  ;;  %v4056_v12 = vld [vmem:[%s5699_s1 + $0x1f8] ss:$12 sps:$4 sm:$0xff]   ;;  %v4059_v14 = vld [vmem:[%s5699_s1 + $0x60] ss:$12 sps:$4 sm:$0xff]   ;;  %v4065_v18 = vld [vmem:[%s5699_s1 + $0x48] ss:$12 sps:$4 sm:$0xff]  }
  0x10   : > { %v4060_v13 = vld [vmem:[%s5699_s1 + $0x1e4] ss:$12 sps:$4 sm:$0xff]   ;;  %v4063_v15 = vld [vmem:[%s5699_s1 + $0x4c] ss:$12 sps:$4 sm:$0xff]   ;;  %v4069_v19 = vld [vmem:[%s5699_s1 + $0x34] ss:$12 sps:$4 sm:$0xff]  }
  0x11   : > { %1778 = vmatpush1.bf16.msra.mxu0 %v4047_v5  ;;  %v4062_v16 = vld [vmem:[%s5699_s1 + $0x1e0] ss:$12 sps:$4 sm:$0xff]   ;;  %v4068_v20 = vld [vmem:[%s5699_s1 + $0x1c8] ss:$12 sps:$4 sm:$0xff]   ;;  %v4071_v22 = vld [vmem:[%s5699_s1 + $0x30] ss:$12 sps:$4 sm:$0xff]  }
  0x12   : > { %1779 = vmatprep.subr.bf16.mxu0 %v4051_v8  ;;  %1891 = vmatpush1.bf16.msra.mxu1 %v4050_v7  ;;  %v4066_v17 = vld [vmem:[%s5699_s1 + $0x1cc] ss:$12 sps:$4 sm:$0xff]   ;;  %v4072_v21 = vld [vmem:[%s5699_s1 + $0x1b4] ss:$12 sps:$4 sm:$0xff]   ;;  %v4075_v23 = vld [vmem:[%s5699_s1 + $0x1c] ss:$12 sps:$4 sm:$0xff]  }
  0x13   : > { %1892 = vmatprep.subr.bf16.mxu1 %v4054_v10  ;;  %v4074_v24 = vld [vmem:[%s5699_s1 + $0x1b0] ss:$12 sps:$4 sm:$0xff]   ;;  %v4077_v26 = vld [vmem:[%s5699_s1 + $0x18] ss:$12 sps:$4 sm:$0xff]   ;;  %s3349_s19 = sshll.u32 %s3344_s25, 4 }
  0x14   : > { %v4078_v25 = vld [vmem:[%s5699_s1 + $0x19c] ss:$12 sps:$4 sm:$0xff]   ;;  %v4081_v27 = vld [vmem:[%s5699_s1 + $0x4] ss:$12 sps:$4 sm:$0xff]   ;;  %v4083_v30 = vld [vmem:[%s5699_s1] ss:$12 sps:$4 sm:$0xff]  }
  0x15   : > { %1780 = vmatpush1.bf16.msra.mxu0 %v4053_v9  ;;  %v4080_v28 = vld [vmem:[%s5699_s1 + $0x198] ss:$12 sps:$4 sm:$0xff]   ;;  %p273_p3 = scmp.lt.s32.totalorder %s3349_s19, 31  ;;  %v4086_v32 = vld [vmem:[%s5699_s1 + $0x180] ss:$12 sps:$4 sm:$0xff]  }
  0x16   : > { %1781 = vmatprep.subr.bf16.mxu0 %v4057_v11  ;;  %1893 = vmatpush1.bf16.msra.mxu1 %v4056_v12  ;;  %v4084_v29 = vld [vmem:[%s5699_s1 + $0x184] ss:$12 sps:$4 sm:$0xff]   ;;  %v4087_v31 = vld [vmem:[%s5699_s1 + $0x16c] ss:$12 sps:$4 sm:$0xff]   ;;  %v4089_v34 = vld [vmem:[%s5699_s1 + $0x168] ss:$12 sps:$4 sm:$0xff]  }
  0x17   : > { %1894 = vmatprep.subr.bf16.mxu1 %v4060_v13  ;;  %v4090_v33 = vld [vmem:[%s5699_s1 + $0x2ec] ss:$12 sps:$4 sm:$0xff]   ;;  %v4093_v35 = vld [vmem:[%s5699_s1 + $0x154] ss:$12 sps:$4 sm:$0xff]   ;;  %s5715_s19 = smov (!%p273_p3, %s3349_s19), 31 }
  0x18   : > { %v4092_v36 = vld [vmem:[%s5699_s1 + $0x2e8] ss:$12 sps:$4 sm:$0xff]   ;;  %v4095_v38 = vld [vmem:[%s5699_s1 + $0x150] ss:$12 sps:$4 sm:$0xff]   ;;  %s4029_s21 = smul.u32 28, %s5715_s19  ;;  %s3352_s26 = sshll.u32 %s5715_s19, 3 }
  0x19   : > { %1782 = vmatpush1.bf16.msra.mxu0 %v4059_v14  ;;  %v4096_v37 = vld [vmem:[%s5699_s1 + $0x2d4] ss:$12 sps:$4 sm:$0xff]   ;;  %v4099_v39 = vld [vmem:[%s5699_s1 + $0x13c] ss:$12 sps:$4 sm:$0xff]   ;;  %v4101_v42 = vld [vmem:[%s5699_s1 + $0x138] ss:$12 sps:$4 sm:$0xff]   ;;  %s5677_s30 = scalar_lea.vmem %s5705_s7, %s3352_s26 }
  0x1a   : > { %1783 = vmatprep.subr.bf16.mxu0 %v4063_v15  ;;  %1895 = vmatpush1.bf16.msra.mxu1 %v4062_v16  ;;  %v4098_v40 = vld [vmem:[%s5699_s1 + $0x2d0] ss:$12 sps:$4 sm:$0xff]   ;;  %s4584_s10 = scalar_lea.vmem %s5698_s0, %s4029_s21  ;;  %v4104_v44 = vld [vmem:[%s5699_s1 + $0x2b8] ss:$12 sps:$4 sm:$0xff]   ;;  %v4107_v46 = vld [vmem:[%s5699_s1 + $0x120] ss:$12 sps:$4 sm:$0xff]  }
  0x1b   : > { %1896 = vmatprep.subr.bf16.mxu1 %v4066_v17  ;;  %v4102_v41 = vld [vmem:[%s5699_s1 + $0x2bc] ss:$12 sps:$4 sm:$0xff]   ;;  %v4105_v43 = vld [vmem:[%s5699_s1 + $0x124] ss:$12 sps:$4 sm:$0xff]   ;;  %v4111_v48 = vld [vmem:[%s5699_s1 + $0x10c] ss:$12 sps:$4 sm:$0xff]  }
  0x1c   : > { %v4108_v45 = vld [vmem:[%s5699_s1 + $0x2a4] ss:$12 sps:$4 sm:$0xff]   ;;  %v4110_v49 = vld [vmem:[%s5699_s1 + $0x2a0] ss:$12 sps:$4 sm:$0xff]   ;;  %v4113_v52 = vld [vmem:[%s5699_s1 + $0x108] ss:$12 sps:$4 sm:$0xff]  }
  0x1d   : > { %1784 = vmatpush1.bf16.msra.mxu0 %v4065_v18  ;;  %v4136_v47 = vld [vmem:[%s4584_s10 + $0x4] ss:$28 sps:$4 sm:$0xff]   ;;  %v4114_v50 = vld [vmem:[%s5699_s1 + $0x28c] ss:$12 sps:$4 sm:$0xff]   ;;  %v4116_v54 = vld [vmem:[%s5699_s1 + $0x288] ss:$12 sps:$4 sm:$0xff]  }
  0x1e   : > { %1785 = vmatprep.subr.bf16.mxu0 %v4069_v19  ;;  %1897 = vmatpush1.bf16.msra.mxu1 %v4068_v20  ;;  %v4143_v51 = vld [vmem:[%s4584_s10 + $0xc] ss:$28 sps:$4 sm:$0xff]   ;;  %v4117_v53 = vld [vmem:[%s5699_s1 + $0xf4] ss:$12 sps:$4 sm:$0xff]   ;;  %v4119_v56 = vld [vmem:[%s5699_s1 + $0xf0] ss:$12 sps:$4 sm:$0xff]  }
  0x1f   : > { %1898 = vmatprep.subr.bf16.mxu1 %v4072_v21  ;;  %1807 = vmatprep.mubr.bf16.mxu0 %v4136_v47  ;;  %v4120_v55 = vld [vmem:[%s5699_s1 + $0x274] ss:$12 sps:$4 sm:$0xff]   ;;  %v4123_v57 = vld [vmem:[%s5699_s1 + $0xdc] ss:$12 sps:$4 sm:$0xff]   ;;  %v4125_v60 = vld [vmem:[%s5699_s1 + $0xd8] ss:$12 sps:$4 sm:$0xff]  }
  0x20   : > { %1920 = vmatprep.mubr.bf16.mxu1 %v4143_v51  ;;  %v4122_v58 = vld [vmem:[%s5699_s1 + $0x270] ss:$12 sps:$4 sm:$0xff]   ;;  %v4128_v62 = vld [vmem:[%s5699_s1 + $0x258] ss:$12 sps:$4 sm:$0xff]   ;;  %v4131_v0 = vld [vmem:[%s5699_s1 + $0xc0] ss:$12 sps:$4 sm:$0xff]  }
  0x21   : > { %1786 = vmatpush1.bf16.msra.mxu0 %v4071_v22  ;;  %v4126_v59 = vld [vmem:[%s5699_s1 + $0x25c] ss:$12 sps:$4 sm:$0xff]   ;;  %v4129_v61 = vld [vmem:[%s5699_s1 + $0xc4] ss:$12 sps:$4 sm:$0xff]   ;;  %v4140_v1 = vld [vmem:[%s5699_s1 + $0x3ac] ss:$12 sps:$4 sm:$0xff]  }
  0x22   : > { %1787 = vmatprep.subr.bf16.mxu0 %v4075_v23  ;;  %1899 = vmatpush1.bf16.msra.mxu1 %v4074_v24  ;;  %v4132_v63 = vld [vmem:[%s5699_s1 + $0x244] ss:$12 sps:$4 sm:$0xff]   ;;  %v4137_v2 = vld [vmem:[%s5699_s1 + $0x240] ss:$12 sps:$4 sm:$0xff]   ;;  %v4138_v4 = vld [vmem:[%s5699_s1 + $0x3a8] ss:$12 sps:$4 sm:$0xff]  }
  0x23   : > { %1900 = vmatprep.subr.bf16.mxu1 %v4078_v25  ;;  %v4134_v3 = vld [vmem:[%s4584_s10] ss:$28 sps:$4 sm:$0xff]   ;;  %v4141_v5 = vld [vmem:[%s4584_s10 + $0x8] ss:$28 sps:$4 sm:$0xff]   ;;  %v4149_v11 = vld [vmem:[%s4584_s10 + $0x38] ss:$28 sps:$4 sm:$0xff]  }
  0x24   : > { %v4147_v6 = vld [vmem:[%s4584_s10 + $0x3c] ss:$28 sps:$4 sm:$0xff]   ;;  %v4146_v7 = vld [vmem:[%s5699_s1 + $0x394] ss:$12 sps:$4 sm:$0xff]   ;;  %v4158_v16 = vld [vmem:[%s5699_s1 + $0x364] ss:$12 sps:$4 sm:$0xff]  }
  0x25   : > { %1788 = vmatpush1.bf16.msra.mxu0 %v4077_v26  ;;  %v4153_v8 = vld [vmem:[%s4584_s10 + $0x44] ss:$28 sps:$4 sm:$0xff]   ;;  %v4144_v9 = vld [vmem:[%s5699_s1 + $0x390] ss:$12 sps:$4 sm:$0xff]   ;;  %v4192_v12 = vld [vmem:[%s5699_s1 + $0x528] ss:$12 sps:$4 sm:$0xff]  }
  0x26   : > { %1789 = vmatprep.subr.bf16.mxu0 %v4081_v27  ;;  %1901 = vmatpush1.bf16.msra.mxu1 %v4080_v28  ;;  %v4152_v10 = vld [vmem:[%s5699_s1 + $0x37c] ss:$12 sps:$4 sm:$0xff]   ;;  %v4150_v13 = vld [vmem:[%s5699_s1 + $0x378] ss:$12 sps:$4 sm:$0xff]   ;;  %v4159_v17 = vld [vmem:[%s4584_s10 + $0x74] ss:$28 sps:$4 sm:$0xff]  }
  0x27   : > { %1902 = vmatprep.subr.bf16.mxu1 %v4084_v29  ;;  %v4194_v14 = vld [vmem:[%s5699_s1 + $0x52c] ss:$12 sps:$4 sm:$0xff]   ;;  %v4155_v15 = vld [vmem:[%s4584_s10 + $0x40] ss:$28 sps:$4 sm:$0xff]   ;;  %v4162_v25 = vld [vmem:[%s5699_s1 + $0x348] ss:$12 sps:$4 sm:$0xff]  }
  0x28   : > { %v4200_v18 = vld [vmem:[%s5699_s1 + $0x514] ss:$12 sps:$4 sm:$0xff]   ;;  %v4165_v19 = vld [vmem:[%s4584_s10 + $0x7c] ss:$28 sps:$4 sm:$0xff]   ;;  %v4161_v23 = vld [vmem:[%s4584_s10 + $0x70] ss:$28 sps:$4 sm:$0xff]  }
  0x29   : > { %1790 = vmatpush1.bf16.msra.mxu0 %v4083_v30  ;;  %v4198_v20 = vld [vmem:[%s5699_s1 + $0x510] ss:$12 sps:$4 sm:$0xff]   ;;  %v4156_v21 = vld [vmem:[%s5699_s1 + $0x360] ss:$12 sps:$4 sm:$0xff]   ;;  %v4210_v24 = vld [vmem:[%s5699_s1 + $0x4f8] ss:$12 sps:$4 sm:$0xff]  }
  0x2a   : > { %1791 = vmatprep.subr.bf16.mxu0 %v4087_v31  ;;  %1903 = vmatpush1.bf16.msra.mxu1 %v4086_v32  ;;  %v4164_v22 = vld [vmem:[%s5699_s1 + $0x34c] ss:$12 sps:$4 sm:$0xff]   ;;  %v4212_v26 = vld [vmem:[%s5699_s1 + $0x4fc] ss:$12 sps:$4 sm:$0xff]   ;;  %v4170_v28 = vld [vmem:[%s5699_s1 + $0x334] ss:$12 sps:$4 sm:$0xff]  }
  0x2b   : > { %1904 = vmatprep.subr.bf16.mxu1 %v4090_v33  ;;  %v4167_v27 = vld [vmem:[%s4584_s10 + $0x78] ss:$28 sps:$4 sm:$0xff]   ;;  %v4710_v29 = vld [vmem:[%s4584_s10 + $0xac] ss:$28 sps:$4 sm:$0xff]   ;;  %v4218_v30 = vld [vmem:[%s5699_s1 + $0x4e4] ss:$12 sps:$4 sm:$0xff]  }
  0x2c   : > { %v4716_v31 = vld [vmem:[%s4584_s10 + $0xb4] ss:$28 sps:$4 sm:$0xff]   ;;  %v4216_v32 = vld [vmem:[%s5699_s1 + $0x4e0] ss:$12 sps:$4 sm:$0xff]   ;;  %v4782_v51 = vld [vmem:[%s4584_s10 + $0xe8] ss:$28 sps:$4 sm:$0xff]  }
  0x2d   : > { %1792 = vmatpush2.bf16.msra.mxu0 %v4089_v34  ;;  %v4168_v33 = vld [vmem:[%s5699_s1 + $0x330] ss:$12 sps:$4 sm:$0xff]  }
  0x2e   : > { %1793 = vmatprep.subr.bf16.mxu0 %v4093_v35  ;;  %1905 = vmatpush2.bf16.msra.mxu1 %v4092_v36  ;;  %v4176_v34 = vld [vmem:[%s5699_s1 + $0x31c] ss:$12 sps:$4 sm:$0xff]  }
  0x2f   : > { %1906 = vmatprep.subr.bf16.mxu1 %v4096_v37  ;;  %v4729_v35 = vld [vmem:[%s4584_s10 + $0xa8] ss:$28 sps:$4 sm:$0xff]   ;;  %v4769_v47 = vld [vmem:[%s4584_s10 + $0xe0] ss:$28 sps:$4 sm:$0xff]  }
  0x30   : > { %v4228_v36 = vld [vmem:[%s5699_s1 + $0x4c8] ss:$12 sps:$4 sm:$0xff]   ;;  %v4174_v37 = vld [vmem:[%s5699_s1 + $0x318] ss:$12 sps:$4 sm:$0xff]  }
  0x31   : > { %1794 = vmatpush2.bf16.msra.mxu0 %v4095_v38  ;;  %v4230_v38 = vld [vmem:[%s5699_s1 + $0x4cc] ss:$12 sps:$4 sm:$0xff]  }
  0x32   : > { %1795 = vmatprep.subr.bf16.mxu0 %v4099_v39  ;;  %1907 = vmatpush2.bf16.msra.mxu1 %v4098_v40  ;;  %v4742_v39 = vld [vmem:[%s4584_s10 + $0xb0] ss:$28 sps:$4 sm:$0xff]  }
  0x33   : > { %1908 = vmatprep.subr.bf16.mxu1 %v4102_v41  ;;  %v4182_v40 = vld [vmem:[%s5699_s1 + $0x304] ss:$12 sps:$4 sm:$0xff]  }
  0x34   : > { %v4748_v41 = vld [vmem:[%s4584_s10 + $0xe4] ss:$28 sps:$4 sm:$0xff]  }
  0x35   : > { %1796 = vmatpush2.bf16.msra.mxu0 %v4101_v42  ;;  %v4236_v42 = vld [vmem:[%s5699_s1 + $0x4b4] ss:$12 sps:$4 sm:$0xff]  }
  0x36   : > { %1797 = vmatprep.subr.bf16.mxu0 %v4105_v43  ;;  %1909 = vmatpush2.bf16.msra.mxu1 %v4104_v44  ;;  %v4754_v43 = vld [vmem:[%s4584_s10 + $0xec] ss:$28 sps:$4 sm:$0xff]   ;;  %v4234_v44 = vld [vmem:[%s5699_s1 + $0x4b0] ss:$12 sps:$4 sm:$0xff]  }
  0x37   : > { %1910 = vmatprep.subr.bf16.mxu1 %v4108_v45  ;;  %v4180_v45 = vld [vmem:[%s5699_s1 + $0x300] ss:$12 sps:$4 sm:$0xff]  }
  0x39   : > { %1798 = vmatpush2.bf16.msra.mxu0 %v4107_v46  ;;  %v4188_v46 = vld [vmem:[%s5699_s1 + $0x46c] ss:$12 sps:$4 sm:$0xff]  }
  0x3a   : > { %1799 = vmatprep.subr.bf16.mxu0 %v4111_v48  ;;  %1911 = vmatpush2.bf16.msra.mxu1 %v4110_v49  ;;  %v4246_v48 = vld [vmem:[%s5699_s1 + $0x498] ss:$12 sps:$4 sm:$0xff]   ;;  %v4186_v49 = vld [vmem:[%s5699_s1 + $0x468] ss:$12 sps:$4 sm:$0xff]  }
  0x3b   : > { %1912 = vmatprep.subr.bf16.mxu1 %v4114_v50  ;;  %v4248_v50 = vld [vmem:[%s5699_s1 + $0x49c] ss:$12 sps:$4 sm:$0xff]  }
  0x3d   : > { %1800 = vmatpush2.bf16.msra.mxu0 %v4113_v52  ;;  %v4197_v52 = vld [vmem:[%s5699_s1 + $0x454] ss:$12 sps:$4 sm:$0xff]  }
  0x3e   : > { %1801 = vmatprep.subr.bf16.mxu0 %v4117_v53  ;;  %1913 = vmatpush2.bf16.msra.mxu1 %v4116_v54  ;;  %v4788_v53 = vld [vmem:[%s4584_s10 + $0x11c] ss:$28 sps:$4 sm:$0xff]   ;;  %v4254_v54 = vld [vmem:[%s5699_s1 + $0x484] ss:$12 sps:$4 sm:$0xff]  }
  0x3f   : > { %1914 = vmatprep.subr.bf16.mxu1 %v4120_v55  ;;  %v4794_v55 = vld [vmem:[%s4584_s10 + $0x124] ss:$28 sps:$4 sm:$0xff]  }
  0x41   : > { %1802 = vmatpush2.bf16.msra.mxu0 %v4119_v56  ;;  %v4252_v56 = vld [vmem:[%s5699_s1 + $0x480] ss:$12 sps:$4 sm:$0xff]  }
  0x42   : > { %1803 = vmatprep.subr.bf16.mxu0 %v4123_v57  ;;  %1915 = vmatpush2.bf16.msra.mxu1 %v4122_v58  ;;  %v4195_v57 = vld [vmem:[%s5699_s1 + $0x450] ss:$12 sps:$4 sm:$0xff]  }
  0x43   : > { %1916 = vmatprep.subr.bf16.mxu1 %v4126_v59  ;;  %v4206_v58 = vld [vmem:[%s5699_s1 + $0x43c] ss:$12 sps:$4 sm:$0xff]   ;;  %v4809_v59 = vld [vmem:[%s4584_s10 + $0x118] ss:$28 sps:$4 sm:$0xff]  }
  0x45   : > { %1804 = vmatpush2.bf16.msra.mxu0 %v4125_v60  ;;  %v4204_v60 = vld [vmem:[%s5699_s1 + $0x438] ss:$12 sps:$4 sm:$0xff]  }
  0x46   : > { %1805 = vmatprep.subr.bf16.mxu0 %v4129_v61  ;;  %1917 = vmatpush2.bf16.msra.mxu1 %v4128_v62  ;;  %v4816_v61 = vld [vmem:[%s4584_s10 + $0x120] ss:$28 sps:$4 sm:$0xff]   ;;  %v4819_v62 = vld [vmem:[%s4584_s10 + $0x154] ss:$28 sps:$4 sm:$0xff]  }
  0x47   : > { %1918 = vmatprep.subr.bf16.mxu1 %v4132_v63  ;;  %v4215_v63 = vld [vmem:[%s5699_s1 + $0x424] ss:$12 sps:$4 sm:$0xff]  }
  0x49   : > { %1806 = vmatpush2.bf16.msra.mxu0 %v4131_v0  ;;  %v4825_v0 = vld [vmem:[%s4584_s10 + $0x15c] ss:$28 sps:$4 sm:$0xff]  }
  0x4a   : > { %2001 = vmatprep.subr.bf16.mxu0 %v4140_v1  ;;  %1919 = vmatpush2.bf16.msra.mxu1 %v4137_v2  ;;  %v4213_v1 = vld [vmem:[%s5699_s1 + $0x420] ss:$12 sps:$4 sm:$0xff]  }
  0x4b   : > { %2114 = vmatprep.subr.bf16.mxu1 %v4194_v14  ;;  %v4834_v2 = vld [vmem:[%s4584_s10 + $0x150] ss:$28 sps:$4 sm:$0xff]  }
  0x4c   : > { %1808 = vmatmul.mubr.bf16.vlgmr.msra.gmra.mxu0 %v4134_v3  ;;  %v4224_v3 = vld [vmem:[%s5699_s1 + $0x40c] ss:$12 sps:$4 sm:$0xff]   ;;  %v4285_v14 = vld [vmem:[%s5699_s1 + $0x2f0] ss:$12 sps:$4 sm:$0xff]  }
  0x4d   : > { %2002 = vmatpush1.bf16.msra.mxu0 %v4138_v4  ;;  %1817 = vmatprep.mubr.bf16.mxu0 %v4147_v6  ;;  %v4222_v4 = vld [vmem:[%s5699_s1 + $0x408] ss:$12 sps:$4 sm:$0xff]  }
  0x4e   : > { %1921 = vmatmul.mubr.bf16.vlgmr.msra.gmra.mxu1 %v4141_v5  ;;  %2003 = vmatprep.subr.bf16.mxu0 %v4146_v7  ;;  %v4844_v5 = vld [vmem:[%s4584_s10 + $0x158] ss:$28 sps:$4 sm:$0xff]   ;;  %v4847_v6 = vld [vmem:[%s4584_s10 + $0x18c] ss:$28 sps:$4 sm:$0xff]  }
  0x4f   : > { %1930 = vmatprep.mubr.bf16.mxu1 %v4153_v8  ;;  %2115 = vmatpush1.bf16.msra.mxu1 %v4192_v12  ;;  %v4233_v7 = vld [vmem:[%s5699_s1 + $0x3f4] ss:$12 sps:$4 sm:$0xff]   ;;  %v4240_v12 = vld [vmem:[%s5699_s1 + $0x3d8] ss:$12 sps:$4 sm:$0xff]  }
  0x50   : > { %2116 = vmatprep.subr.bf16.mxu1 %v4200_v18  ;;  %v4853_v8 = vld [vmem:[%s4584_s10 + $0x194] ss:$28 sps:$4 sm:$0xff]  }
  0x51   : > { %2004 = vmatpush1.bf16.msra.mxu0 %v4144_v9  ;;  %v4231_v9 = vld [vmem:[%s5699_s1 + $0x3f0] ss:$12 sps:$4 sm:$0xff]  }
  0x52   : > { %2005 = vmatprep.subr.bf16.mxu0 %v4152_v10  ;;  %v4862_v10 = vld [vmem:[%s4584_s10 + $0x188] ss:$28 sps:$4 sm:$0xff]   ;;  %v4890_v18 = vld [vmem:[%s4584_s10 + $0x10] ss:$28 sps:$4 sm:$0xff]  }
  0x53   : > { %2117 = vmatpush1.bf16.msra.mxu1 %v4198_v20  ;;  %v4395_v20 = vmov 0  }
  0x54   : > { %1818 = vmatmul.mubr.bf16.gmra.mxu0 %v4149_v11  ;;  %2118 = vmatprep.subr.bf16.mxu1 %v4212_v26  ;;  %v4242_v11 = vld [vmem:[%s5699_s1 + $0x3dc] ss:$12 sps:$4 sm:$0xff]   ;;  %v4287_v26 = vld [vmem:[%s5699_s1 + $0x2d8] ss:$12 sps:$4 sm:$0xff]  }
  0x55   : > { %2006 = vmatpush1.bf16.msra.mxu0 %v4150_v13  ;;  %1827 = vmatprep.mubr.bf16.mxu0 %v4159_v17  ;;  %v4872_v13 = vld [vmem:[%s4584_s10 + $0x190] ss:$28 sps:$4 sm:$0xff]  }
  0x56   : > { %1931 = vmatmul.mubr.bf16.gmra.mxu1 %v4155_v15  ;;  %2007 = vmatprep.subr.bf16.mxu0 %v4158_v16  ;;  %v4878_v15 = vld [vmem:[%s4584_s10 + $0x14] ss:$28 sps:$4 sm:$0xff]   ;;  %v4249_v17 = vld [vmem:[%s5699_s1 + $0x3c0] ss:$12 sps:$4 sm:$0xff]  }
  0x57   : > { %1940 = vmatprep.mubr.bf16.mxu1 %v4165_v19  ;;  %2119 = vmatpush1.bf16.msra.mxu1 %v4210_v24  ;;  %v4251_v16 = vld [vmem:[%s5699_s1 + $0x3c4] ss:$12 sps:$4 sm:$0xff]  }
  0x58   : > { %2120 = vmatprep.subr.bf16.mxu1 %v4218_v30  ;;  %v4258_v19 = vld [vmem:[%s5699_s1 + $0x170] ss:$12 sps:$4 sm:$0xff]   ;;  %v4264_v24 = vld [vmem:[%s5699_s1 + $0x158] ss:$12 sps:$4 sm:$0xff]   ;;  %v4270_v30 = vld [vmem:[%s5699_s1 + $0x140] ss:$12 sps:$4 sm:$0xff]  }
  0x59   : > { %2008 = vmatpush1.bf16.msra.mxu0 %v4156_v21  ;;  %v4259_v21 = vld [vmem:[%s5699_s1 + $0xb0] ss:$12 sps:$4 sm:$0xff]  }
  0x5a   : > { %2009 = vmatprep.subr.bf16.mxu0 %v4164_v22  ;;  %v4900_v22 = vld [vmem:[%s4584_s10 + $0x18] ss:$28 sps:$4 sm:$0xff]  }
  0x5b   : > { %2121 = vmatpush1.bf16.msra.mxu1 %v4216_v32  ;;  %v4928_v32 = vld [vmem:[%s4584_s10 + $0x84] ss:$28 sps:$4 sm:$0xff]  }
  0x5c   : > { %1828 = vmatmul.mubr.bf16.gmra.mxu0 %v4161_v23  ;;  %2122 = vmatprep.subr.bf16.mxu1 %v4230_v38  ;;  %v4903_v23 = vld [vmem:[%s4584_s10 + $0x4c] ss:$28 sps:$4 sm:$0xff]  }
  0x5d   : > { %2010 = vmatpush1.bf16.msra.mxu0 %v4162_v25  ;;  %1837 = vmatprep.mubr.bf16.mxu0 %v4710_v29  ;;  %v4286_v25 = vld [vmem:[%s5699_s1 + $0x230] ss:$12 sps:$4 sm:$0xff]   ;;  %v4276_v38 = vld [vmem:[%s5699_s1 + $0x128] ss:$12 sps:$4 sm:$0xff]  }
  0x5e   : > { %1941 = vmatmul.mubr.bf16.gmra.mxu1 %v4167_v27  ;;  %2011 = vmatprep.subr.bf16.mxu0 %v4170_v28  ;;  %v4265_v27 = vld [vmem:[%s5699_s1 + $0x98] ss:$12 sps:$4 sm:$0xff]  }
  0x5f   : > { %1950 = vmatprep.mubr.bf16.mxu1 %v4716_v31  ;;  %2123 = vmatpush1.bf16.msra.mxu1 %v4228_v36  ;;  %v4921_v28 = vld [vmem:[%s4584_s10 + $0x48] ss:$28 sps:$4 sm:$0xff]   ;;  %v4295_v36 = vld [vmem:[%s5699_s1 + $0x2c0] ss:$12 sps:$4 sm:$0xff]  }
  0x60   : > { %2124 = vmatprep.subr.bf16.mxu1 %v4236_v42  ;;  %v4297_v42 = vld [vmem:[%s5699_s1 + $0x2a8] ss:$12 sps:$4 sm:$0xff]  }
  0x61   : > { %2012 = vmatpush1.bf16.msra.mxu0 %v4168_v33  ;;  %v4290_v33 = vld [vmem:[%s5699_s1 + $0x218] ss:$12 sps:$4 sm:$0xff]  }
  0x62   : > { %2013 = vmatprep.subr.bf16.mxu0 %v4176_v34  ;;  %v4934_v34 = vld [vmem:[%s4584_s10 + $0x50] ss:$28 sps:$4 sm:$0xff]  }
  0x63   : > { %2125 = vmatpush1.bf16.msra.mxu1 %v4234_v44  ;;  %v4277_v44 = vld [vmem:[%s5699_s1 + $0x68] ss:$12 sps:$4 sm:$0xff]  }
  0x64   : > { %1838 = vmatmul.mubr.bf16.gmra.mxu0 %v4729_v35  ;;  %2126 = vmatprep.subr.bf16.mxu1 %v4248_v50  ;;  %v4971_v50 = vld [vmem:[%s4584_s10 + $0x88] ss:$28 sps:$4 sm:$0xff]  }
  0x65   : > { %2014 = vmatpush1.bf16.msra.mxu0 %v4174_v37  ;;  %1847 = vmatprep.mubr.bf16.mxu0 %v4748_v41  ;;  %v4271_v37 = vld [vmem:[%s5699_s1 + $0x80] ss:$12 sps:$4 sm:$0xff]  }
  0x66   : > { %1951 = vmatmul.mubr.bf16.gmra.mxu1 %v4742_v39  ;;  %2015 = vmatprep.subr.bf16.mxu0 %v4182_v40  ;;  %v4296_v40 = vld [vmem:[%s5699_s1 + $0x200] ss:$12 sps:$4 sm:$0xff]  }
  0x67   : > { %1960 = vmatprep.mubr.bf16.mxu1 %v4754_v43  ;;  %2127 = vmatpush1.bf16.msra.mxu1 %v4246_v48  ;;  %v4965_v48 = vld [vmem:[%s4584_s10 + $0xbc] ss:$28 sps:$4 sm:$0xff]  }
  0x68   : > { %2128 = vmatprep.subr.bf16.mxu1 %v4254_v54  ;;  %v4283_v54 = vld [vmem:[%s5699_s1 + $0x50] ss:$12 sps:$4 sm:$0xff]  }
  0x69   : > { %2016 = vmatpush1.bf16.msra.mxu0 %v4180_v45  ;;  %v4958_v45 = vld [vmem:[%s4584_s10 + $0x80] ss:$28 sps:$4 sm:$0xff]  }
  0x6a   : > { %2017 = vmatprep.subr.bf16.mxu0 %v4188_v46  ;;  %v4282_v46 = vld [vmem:[%s5699_s1 + $0x110] ss:$12 sps:$4 sm:$0xff]  }
  0x6b   : > { %2129 = vmatpush1.bf16.msra.mxu1 %v4252_v56  ;;  %v4292_v56 = vld [vmem:[%s5699_s1 + $0xf8] ss:$12 sps:$4 sm:$0xff]  }
  0x6c   : > { %1848 = vmatmul.mubr.bf16.gmra.mxu0 %v4769_v47  ;;  %3677 = vmatprep.subr.bf16.mxu1 %v4285_v14  ;;  %v4316_v14 = vld [vmem:[%s5699_s1 + $0x1a0] ss:$12 sps:$4 sm:$0xff]  }
  0x6d   : > { %2018 = vmatpush2.bf16.msra.mxu0 %v4186_v49  ;;  %1857 = vmatprep.mubr.bf16.mxu0 %v4788_v53  ;;  %v4300_v49 = vld [vmem:[%s5699_s1 + $0x1e8] ss:$12 sps:$4 sm:$0xff]  }
  0x6e   : > { %1961 = vmatmul.mubr.bf16.gmra.mxu1 %v4782_v51  ;;  %2019 = vmatprep.subr.bf16.mxu0 %v4197_v52  ;;  %v4305_v52 = vld [vmem:[%s5699_s1 + $0x290] ss:$12 sps:$4 sm:$0xff]  }
  0x6f   : > { %1970 = vmatprep.mubr.bf16.mxu1 %v4794_v55 }
  0x71   : > { %2020 = vmatpush2.bf16.msra.mxu0 %v4195_v57  ;;  %v4306_v57 = vld [vmem:[%s5699_s1 + $0x1d0] ss:$12 sps:$4 sm:$0xff]  }
  0x72   : > { %2021 = vmatprep.subr.bf16.mxu0 %v4206_v58  ;;  %v4307_v58 = vld [vmem:[%s5699_s1 + $0x278] ss:$12 sps:$4 sm:$0xff]  }
  0x74   : > { %1858 = vmatmul.mubr.bf16.gmra.mxu0 %v4809_v59 }
  0x75   : > { %2022 = vmatpush2.bf16.msra.mxu0 %v4204_v60  ;;  %1867 = vmatprep.mubr.bf16.mxu0 %v4819_v62  ;;  %v4293_v60 = vld [vmem:[%s5699_s1 + $0x38] ss:$12 sps:$4 sm:$0xff]  }
  0x76   : > { %1971 = vmatmul.mubr.bf16.gmra.mxu1 %v4816_v61  ;;  %2023 = vmatprep.subr.bf16.mxu0 %v4215_v63  ;;  %v4995_v63 = vld [vmem:[%s4584_s10 + $0xb8] ss:$28 sps:$4 sm:$0xff]  }
  0x77   : > { %1980 = vmatprep.mubr.bf16.mxu1 %v4825_v0 }
  0x79   : > { %2024 = vmatpush2.bf16.msra.mxu0 %v4213_v1  ;;  %v4302_v1 = vld [vmem:[%s5699_s1 + $0xe0] ss:$12 sps:$4 sm:$0xff]  }
  0x7a   : > { %2025 = vmatprep.subr.bf16.mxu0 %v4224_v3  ;;  %v5002_v3 = vld [vmem:[%s4584_s10 + $0xf4] ss:$28 sps:$4 sm:$0xff]  }
  0x7c   : > { %1868 = vmatmul.mubr.bf16.gmra.mxu0 %v4834_v2 }
  0x7d   : > { %2026 = vmatpush2.bf16.msra.mxu0 %v4222_v4  ;;  %1877 = vmatprep.mubr.bf16.mxu0 %v4847_v6  ;;  %v4310_v4 = vld [vmem:[%s5699_s1 + $0x1b8] ss:$12 sps:$4 sm:$0xff]  }
  0x7e   : > { %1981 = vmatmul.mubr.bf16.gmra.mxu1 %v4844_v5  ;;  %2027 = vmatprep.subr.bf16.mxu0 %v4233_v7  ;;  %v5008_v7 = vld [vmem:[%s4584_s10 + $0xc0] ss:$28 sps:$4 sm:$0xff]  }
  0x7f   : > { %1990 = vmatprep.mubr.bf16.mxu1 %v4853_v8 }
  0x81   : > { %2028 = vmatpush2.bf16.msra.mxu0 %v4231_v9  ;;  %v4315_v9 = vld [vmem:[%s5699_s1 + $0x260] ss:$12 sps:$4 sm:$0xff]  }
  0x82   : > { %2029 = vmatprep.subr.bf16.mxu0 %v4242_v11  ;;  %v4303_v11 = vld [vmem:[%s5699_s1 + $0x20] ss:$12 sps:$4 sm:$0xff]  }
  0x84   : > { %1878 = vmatmul.mubr.bf16.gmra.mxu0 %v4862_v10 }
  0x85   : > { %2030 = vmatpush2.bf16.msra.mxu0 %v4240_v12  ;;  %2033 = vmatprep.mubr.bf16.mxu0 %v4878_v15  ;;  %v4312_v12 = vld [vmem:[%s5699_s1 + $0xc8] ss:$12 sps:$4 sm:$0xff]  }
  0x86   : > { %1991 = vmatmul.mubr.bf16.gmra.mxu1 %v4872_v13  ;;  %2031 = vmatprep.subr.bf16.mxu0 %v4251_v16  ;;  %v4317_v16 = vld [vmem:[%s5699_s1 + $0x248] ss:$12 sps:$4 sm:$0xff]  }
  0x87   : > { %2146 = vmatprep.mubr.bf16.mxu1 %v4395_v20 }
  0x89   : > { %2032 = vmatpush2.bf16.msra.mxu0 %v4249_v17  ;;  %v4313_v17 = vld [vmem:[%s5699_s1 + $0x8] ss:$12 sps:$4 sm:$0xff]  }
  0x8a   : > { %3613 = vmatprep.subr.bf16.mxu0 %v4258_v19  ;;  %v5032_v19 = vld [vmem:[%s4584_s10 + $0xf0] ss:$28 sps:$4 sm:$0xff]  }
  0x8c   : > { %2034 = vmatmul.mubr.bf16.vlgmr.msra.gmra.mxu0 %v4890_v18 }
  0x8d   : > { %3614 = vmatpush3.bf16.msra.mxu0 %v4259_v21  ;;  %2043 = vmatprep.mubr.bf16.mxu0 %v4903_v23  ;;  %v4319_v21 = vld [vmem:[%s5699_s1 + $0x470] ss:$12 sps:$4 sm:$0xff]  }
  0x8e   : > { %2147 = vmatmul.mubr.bf16.vlgmr.msra.gmra.mxu1 %v4900_v22  ;;  %3615 = vmatprep.subr.bf16.mxu0 %v4264_v24  ;;  %v4318_v24 = vld [vmem:[%s5699_s1 + $0x188] ss:$12 sps:$4 sm:$0xff]  }
  0x8f   : > { %2156 = vmatprep.mubr.bf16.mxu1 %v4395_v20  ;;  %3678 = vmatpush3.bf16.msra.mxu1 %v4286_v25  ;;  %v4329_v25 = vld [vmem:[%s5699_s1 + $0x530] ss:$12 sps:$4 sm:$0xff]  }
  0x90   : > { %3679 = vmatprep.subr.bf16.mxu1 %v4287_v26  ;;  %v5045_v26 = vld [vmem:[%s4584_s10 + $0x12c] ss:$28 sps:$4 sm:$0xff]  }
  0x91   : > { %3616 = vmatpush3.bf16.msra.mxu0 %v4265_v27  ;;  %v5048_v27 = vld [vmem:[%s4584_s10 + $0xf8] ss:$28 sps:$4 sm:$0xff]  }
  0x92   : > { %3617 = vmatprep.subr.bf16.mxu0 %v4270_v30  ;;  %v5055_v30 = vld [vmem:[%s4584_s10 + $0x128] ss:$28 sps:$4 sm:$0xff]  }
  0x93   : > { %3680 = vmatpush3.bf16.msra.mxu1 %v4290_v33  ;;  %v5058_v33 = vld [vmem:[%s4584_s10 + $0x164] ss:$28 sps:$4 sm:$0xff]  }
  0x94   : > { %2044 = vmatmul.mubr.bf16.gmra.mxu0 %v4921_v28  ;;  %3681 = vmatprep.subr.bf16.mxu1 %v4295_v36  ;;  %v5061_v36 = vld [vmem:[%s4584_s10 + $0x130] ss:$28 sps:$4 sm:$0xff]  }
  0x95   : > { %2053 = vmatprep.mubr.bf16.mxu0 %v4928_v32  ;;  %3618 = vmatpush3.bf16.msra.mxu0 %v4271_v37  ;;  %v5067_v37 = vld [vmem:[%s4584_s10 + $0x160] ss:$28 sps:$4 sm:$0xff]  }
  0x96   : > { %2157 = vmatmul.mubr.bf16.gmra.mxu1 %v4934_v34  ;;  %3619 = vmatprep.subr.bf16.mxu0 %v4276_v38  ;;  %v5071_v38 = vld [vmem:[%s4584_s10 + $0x19c] ss:$28 sps:$4 sm:$0xff]  }
  0x97   : > { %2166 = vmatprep.mubr.bf16.mxu1 %v4395_v20  ;;  %3682 = vmatpush3.bf16.msra.mxu1 %v4296_v40  ;;  %v5074_v40 = vld [vmem:[%s4584_s10 + $0x168] ss:$28 sps:$4 sm:$0xff]  }
  0x98   : > { %3683 = vmatprep.subr.bf16.mxu1 %v4297_v42  ;;  %v5080_v42 = vld [vmem:[%s4584_s10 + $0x198] ss:$28 sps:$4 sm:$0xff]  }
  0x99   : > { %3620 = vmatpush3.bf16.msra.mxu0 %v4277_v44  ;;  %v5084_v44 = vld [vmem:[%s4584_s10 + $0x1a0] ss:$28 sps:$4 sm:$0xff]  }
  0x9a   : > { %3621 = vmatprep.subr.bf16.mxu0 %v4282_v46  ;;  %v4375_v46 = vld [vmem:[%s4584_s10 + $0x4] ss:$28 sps:$4 sm:$0xff]  }
  0x9b   : > { %3684 = vmatpush3.bf16.msra.mxu1 %v4300_v49  ;;  %v4376_v49 = vld [vmem:[%s4584_s10 + $0xc] ss:$28 sps:$4 sm:$0xff]  }
  0x9c   : > { %2054 = vmatmul.mubr.bf16.gmra.mxu0 %v4958_v45  ;;  %3685 = vmatprep.subr.bf16.mxu1 %v4305_v52  ;;  %v4320_v52 = vld [vmem:[%s5699_s1 + $0x3b0] ss:$12 sps:$4 sm:$0xff]  }
  0x9d   : > { %2063 = vmatprep.mubr.bf16.mxu0 %v4965_v48  ;;  %3622 = vmatpush3.bf16.msra.mxu0 %v4283_v54  ;;  %v4331_v54 = vld [vmem:[%s5699_s1 + $0x518] ss:$12 sps:$4 sm:$0xff]  }
  0x9e   : > { %2167 = vmatmul.mubr.bf16.gmra.mxu1 %v4971_v50  ;;  %3623 = vmatprep.subr.bf16.mxu0 %v4292_v56  ;;  %v4377_v56 = vld [vmem:[%s4584_s10] ss:$28 sps:$4 sm:$0xff]  }
  0x9f   : > { %2176 = vmatprep.mubr.bf16.mxu1 %v4395_v20  ;;  %3686 = vmatpush3.bf16.msra.mxu1 %v4306_v57  ;;  %v4378_v57 = vld [vmem:[%s4584_s10 + $0x3c] ss:$28 sps:$4 sm:$0xff]  }
  0xa0   : > { %3687 = vmatprep.subr.bf16.mxu1 %v4307_v58  ;;  %v4322_v58 = vld [vmem:[%s5699_s1 + $0x398] ss:$12 sps:$4 sm:$0xff]  }
  0xa1   : > { %3624 = vmatpush3.bf16.msra.mxu0 %v4293_v60  ;;  %v4379_v60 = vld [vmem:[%s4584_s10 + $0x8] ss:$28 sps:$4 sm:$0xff]  }
  0xa2   : > { %3625 = vmatprep.subr.bf16.mxu0 %v4302_v1  ;;  %v4323_v1 = vld [vmem:[%s5699_s1 + $0x440] ss:$12 sps:$4 sm:$0xff]  }
  0xa3   : > { %3688 = vmatpush3.bf16.msra.mxu1 %v4310_v4  ;;  %v4380_v4 = vld [vmem:[%s4584_s10 + $0x44] ss:$28 sps:$4 sm:$0xff]  }
  0xa4   : > { %2064 = vmatmul.mubr.bf16.gmra.mxu0 %v4995_v63  ;;  %3689 = vmatprep.subr.bf16.mxu1 %v4315_v9  ;;  %v4333_v9 = vld [vmem:[%s5699_s1 + $0x500] ss:$12 sps:$4 sm:$0xff]  }
  0xa5   : > { %2073 = vmatprep.mubr.bf16.mxu0 %v5002_v3  ;;  %3626 = vmatpush3.bf16.msra.mxu0 %v4303_v11  ;;  %v4324_v11 = vld [vmem:[%s5699_s1 + $0x380] ss:$12 sps:$4 sm:$0xff]  }
  0xa6   : > { %2177 = vmatmul.mubr.bf16.gmra.mxu1 %v5008_v7  ;;  %3627 = vmatprep.subr.bf16.mxu0 %v4312_v12  ;;  %v4325_v12 = vld [vmem:[%s5699_s1 + $0x428] ss:$12 sps:$4 sm:$0xff]  }
  0xa7   : > { %2186 = vmatprep.mubr.bf16.mxu1 %v4395_v20  ;;  %3690 = vmatpush3.bf16.msra.mxu1 %v4316_v14  ;;  %v4381_v14 = vld [vmem:[%s4584_s10 + $0x38] ss:$28 sps:$4 sm:$0xff]  }
  0xa8   : > { %3691 = vmatprep.subr.bf16.mxu1 %v4317_v16  ;;  %v4335_v16 = vld [vmem:[%s5699_s1 + $0x4e8] ss:$12 sps:$4 sm:$0xff]  }
  0xa9   : > { %3628 = vmatpush3.bf16.msra.mxu0 %v4313_v17  ;;  %v4382_v17 = vld [vmem:[%s4584_s10 + $0x74] ss:$28 sps:$4 sm:$0xff]  }
  0xaa   : > { %3741 = vmatprep.subr.bf16.mxu0 %v4319_v21  ;;  %v4326_v21 = vld [vmem:[%s5699_s1 + $0x368] ss:$12 sps:$4 sm:$0xff]  }
  0xab   : > { %3692 = vmatpush3.bf16.msra.mxu1 %v4318_v24  ;;  %v4383_v24 = vld [vmem:[%s4584_s10 + $0x40] ss:$28 sps:$4 sm:$0xff]  }
  0xac   : > { %2074 = vmatmul.mubr.bf16.gmra.mxu0 %v5032_v19  ;;  %3917 = vmatprep.subr.bf16.mxu1 %v4329_v25 }
  0xad   : > { %2083 = vmatprep.mubr.bf16.mxu0 %v5045_v26 }
  0xae   : > { %2187 = vmatmul.mubr.bf16.gmra.mxu1 %v5048_v27 }
  0xaf   : > { %2196 = vmatprep.mubr.bf16.mxu1 %v4395_v20 }
  0xb4   : > { %2084 = vmatmul.mubr.bf16.gmra.mxu0 %v5055_v30 }
  0xb5   : > { %2093 = vmatprep.mubr.bf16.mxu0 %v5058_v33 }
  0xb6   : > { %2197 = vmatmul.mubr.bf16.gmra.mxu1 %v5061_v36 }
  0xb7   : > { %2206 = vmatprep.mubr.bf16.mxu1 %v4395_v20 }
  0xbc   : > { %2094 = vmatmul.mubr.bf16.gmra.mxu0 %v5067_v37 }
  0xbd   : > { %2103 = vmatprep.mubr.bf16.mxu0 %v5071_v38 }
  0xbe   : > { %2207 = vmatmul.mubr.bf16.gmra.mxu1 %v5074_v40 }
  0xbf   : > { %2216 = vmatprep.mubr.bf16.mxu1 %v4395_v20  ;;  %v4321_v20 = vld [vmem:[%s5699_s1 + $0x458] ss:$12 sps:$4 sm:$0xff]  }
  0xc4   : > { %2104 = vmatmul.mubr.bf16.gmra.mxu0 %v5080_v42 }
  0xc5   : > { %2259 = vmatprep.mubr.bf16.mxu0 %v4375_v46  ;;  %v4384_v46 = vld [vmem:[%s4584_s10 + $0x7c] ss:$28 sps:$4 sm:$0xff]  }
  0xc6   : > { %2217 = vmatmul.mubr.bf16.gmra.mxu1 %v5084_v44 }
  0xc7   : > { %2356 = vmatprep.mubr.bf16.mxu1 %v4376_v49  ;;  %v4337_v49 = vld [vmem:[%s5699_s1 + $0x4d0] ss:$12 sps:$4 sm:$0xff]  }
  0xcc   : > { %2260 = vmatmul.mubr.bf16.vlgmr.msra.gmra.mxu0 %v4377_v56  ;;  %v4339_v56 = vld [vmem:[%s5699_s1 + $0x4b8] ss:$12 sps:$4 sm:$0xff]  }
  0xcd   : > { %3742 = vmatpush3.bf16.msra.mxu0 %v4320_v52  ;;  %2267 = vmatprep.mubr.bf16.mxu0 %v4378_v57  ;;  %v4328_v52 = vld [vmem:[%s5699_s1 + $0x350] ss:$12 sps:$4 sm:$0xff]   ;;  %v4332_v57 = vld [vmem:[%s5699_s1 + $0x338] ss:$12 sps:$4 sm:$0xff]  }
  0xce   : > { %2357 = vmatmul.mubr.bf16.vlgmr.msra.gmra.mxu1 %v4379_v60  ;;  %3743 = vmatprep.subr.bf16.mxu0 %v4321_v20  ;;  %v4330_v20 = vld [vmem:[%s5699_s1 + $0x3f8] ss:$12 sps:$4 sm:$0xff]   ;;  %v4334_v60 = vld [vmem:[%s5699_s1 + $0x3e0] ss:$12 sps:$4 sm:$0xff]  }
  0xcf   : > { %2364 = vmatprep.mubr.bf16.mxu1 %v4380_v4  ;;  %3918 = vmatpush3.bf16.msra.mxu1 %v4329_v25  ;;  %v4327_v25 = vld [vmem:[%s5699_s1 + $0x410] ss:$12 sps:$4 sm:$0xff]   ;;  %v4338_v4 = vld [vmem:[%s5699_s1 + $0x3c8] ss:$12 sps:$4 sm:$0xff]  }
  0xd0   : > { %3919 = vmatprep.subr.bf16.mxu1 %v4331_v54 }
  0xd1   : > { %3744 = vmatpush3.bf16.msra.mxu0 %v4322_v58  ;;  %v4386_v58 = vld [vmem:[%s4584_s10 + $0x78] ss:$28 sps:$4 sm:$0xff]  }
  0xd2   : > { %3745 = vmatprep.subr.bf16.mxu0 %v4323_v1  ;;  %v4336_v1 = vld [vmem:[%s5699_s1 + $0x320] ss:$12 sps:$4 sm:$0xff]  }
  0xd3   : > { %3920 = vmatpush3.bf16.msra.mxu1 %v4331_v54  ;;  %v4385_v54 = vld [vmem:[%s4584_s10 + $0x70] ss:$28 sps:$4 sm:$0xff]  }
  0xd4   : > { %2268 = vmatmul.mubr.bf16.gmra.mxu0 %v4381_v14  ;;  %3921 = vmatprep.subr.bf16.mxu1 %v4333_v9  ;;  %v4349_v14 = vld [vmem:[%s5701_s3 + $0x60] sm:$0xff]  }
  0xd5   : > { %2275 = vmatprep.mubr.bf16.mxu0 %v4382_v17  ;;  %3746 = vmatpush3.bf16.msra.mxu0 %v4324_v11 }
  0xd6   : > { %2365 = vmatmul.mubr.bf16.gmra.mxu1 %v4383_v24  ;;  %3747 = vmatprep.subr.bf16.mxu0 %v4325_v12 }
  0xd7   : > { %2372 = vmatprep.mubr.bf16.mxu1 %v4384_v46  ;;  %3922 = vmatpush3.bf16.msra.mxu1 %v4333_v9  ;;  %v4340_v9 = vld [vmem:[%s5699_s1 + $0x308] ss:$12 sps:$4 sm:$0xff]  }
  0xd8   : > { %3923 = vmatprep.subr.bf16.mxu1 %v4335_v16 }
  0xd9   : > { %3748 = vmatpush3.bf16.msra.mxu0 %v4326_v21 }
  0xda   : > { %3749 = vmatprep.subr.bf16.mxu0 %v4327_v25 }
  0xdb   : > { %3924 = vmatpush3.bf16.msra.mxu1 %v4335_v16 }
  0xdc   : > { %2276 = vmatmul.mubr.bf16.gmra.mxu0 %v4385_v54  ;;  %3925 = vmatprep.subr.bf16.mxu1 %v4337_v49 }
  0xdd   : > { %2283 = vmatprep.mubr.bf16.mxu0 %v4710_v29  ;;  %3750 = vmatpush3.bf16.msra.mxu0 %v4328_v52  ;;  %v4341_v29 = vld [vmem:[%s5699_s1 + $0x4a0] ss:$12 sps:$4 sm:$0xff]  }
  0xde   : > { %2373 = vmatmul.mubr.bf16.gmra.mxu1 %v4386_v58  ;;  %3751 = vmatprep.subr.bf16.mxu0 %v4330_v20 }
  0xdf   : > { %2380 = vmatprep.mubr.bf16.mxu1 %v4716_v31  ;;  %3926 = vmatpush3.bf16.msra.mxu1 %v4337_v49  ;;  %v4342_v31 = vld [vmem:[%s5699_s1 + $0x488] ss:$12 sps:$4 sm:$0xff]  }
  0xe0   : > { %3927 = vmatprep.subr.bf16.mxu1 %v4339_v56 }
  0xe1   : > { %3752 = vmatpush3.bf16.msra.mxu0 %v4332_v57  ;;  %v4353_v57 = vld [vmem:[%s5701_s3 + $0x50] sm:$0xff]  }
  0xe2   : > { %3753 = vmatprep.subr.bf16.mxu0 %v4334_v60 }
  0xe3   : > { %3928 = vmatpush3.bf16.msra.mxu1 %v4339_v56 }
  0xe4   : > { %2284 = vmatmul.mubr.bf16.gmra.mxu0 %v4729_v35  ;;  %3929 = vmatprep.subr.bf16.mxu1 %v4341_v29  ;;  %v4343_v35 = vld [vmem:[%s5701_s3 + $0x78] sm:$0xff]  }
  0xe5   : > { %2291 = vmatprep.mubr.bf16.mxu0 %v4748_v41  ;;  %3754 = vmatpush3.bf16.msra.mxu0 %v4336_v1 }
  0xe6   : > { %2381 = vmatmul.mubr.bf16.gmra.mxu1 %v4742_v39  ;;  %3755 = vmatprep.subr.bf16.mxu0 %v4338_v4  ;;  %v576_v39 = vlaneseq }
  0xe7   : > { %2388 = vmatprep.mubr.bf16.mxu1 %v4754_v43  ;;  %3930 = vmatpush3.bf16.msra.mxu1 %v4341_v29 }
  0xe8   : > { %3931 = vmatprep.subr.bf16.mxu1 %v4342_v31  ;;  %v5187_v41 = vshrl.u32 %v576_v39, 7 }
  0xe9   : > { %3756 = vmatpush3.bf16.msra.mxu0 %v4340_v9 }
  0xea   : > { %5708 = vst [vmem:[#allocation2_spill] sm:$0xff] %v5187_v41  ;;  %v578_v43 = vsub.s32 0, %v5187_v41 }
  0xeb   : > { %3932 = vmatpush3.bf16.msra.mxu1 %v4342_v31 }
  0xec   : > { %2292 = vmatmul.mubr.bf16.gmra.mxu0 %v4769_v47  ;;  %3821 = vmatprep.subr.bf16.mxu1 %v4343_v35  ;;  %v5196_v47 = vld [vmem:[%s5700_s2] sm:$0x7] }
  0xed   : > { %2299 = vmatprep.mubr.bf16.mxu0 %v4788_v53  ;;  %5709 = vst [vmem:[#allocation3_spill] sm:$0xff] %v5196_v47  ;;  %v5201_v53 = vrot.slane %v5196_v47, %v578_v43 }
  0xee   : > { %2389 = vmatmul.mubr.bf16.gmra.mxu1 %v4782_v51  ;;  %v582_v51 = vsub.s32 1, %v5187_v41 }
  0xef   : > { %2396 = vmatprep.mubr.bf16.mxu1 %v4794_v55 }
  0xf0   : > { %v5204_v55 = vrot.slane %v5196_v47, %v582_v51 }
  0xf4   : > { %2300 = vmatmul.mubr.bf16.gmra.mxu0 %v4809_v59  ;;  %v4344_v59 = vld [vmem:[%s5701_s3 + $0x38] sm:$0xff]  }
  0xf5   : > { %2307 = vmatprep.mubr.bf16.mxu0 %v4819_v62  ;;  %v4345_v62 = vld [vmem:[%s5701_s3 + $0x70] sm:$0xff]  }
  0xf6   : > { %2397 = vmatmul.mubr.bf16.gmra.mxu1 %v4816_v61 }
  0xf7   : > { %2404 = vmatprep.mubr.bf16.mxu1 %v4825_v0 }
  0xfc   : > { %2308 = vmatmul.mubr.bf16.gmra.mxu0 %v4834_v2 }
  0xfd   : > { %2315 = vmatprep.mubr.bf16.mxu0 %v4847_v6 }
  0xfe   : > { %2405 = vmatmul.mubr.bf16.gmra.mxu1 %v4844_v5 }
  0xff   : > { %2412 = vmatprep.mubr.bf16.mxu1 %v4853_v8 }
 0x104   : > { %2316 = vmatmul.mubr.bf16.gmra.mxu0 %v4862_v10  ;;  %v4346_v10 = vld [vmem:[%s5701_s3 + $0x30] sm:$0xff]  }
 0x105   : > { %2453 = vmatprep.mubr.bf16.mxu0 %v4878_v15 }
 0x106   : > { %2413 = vmatmul.mubr.bf16.gmra.mxu1 %v4872_v13 }
 0x107   : > { %3933 = vmatprep.mubr.bf16.mxu1 %v4900_v22 }
 0x10c   : > { %v1809_v61 = vpop.f32.mrf.mxu0  ;;  %2454 = vmatmul.mubr.bf16.vlgmr.msra.gmra.mxu0 %v4890_v18  ;;  %v4347_v18 = vld [vmem:[%s5701_s3 + $0x68] sm:$0xff]  }
 0x10d   : > { %v1810_v0 = vadd.f32 %v1809_v61, %v5201_v53  ;;  %2461 = vmatprep.mubr.bf16.mxu0 %v4903_v23 }
 0x10e   : > { %v1811_v2 = vpop.f32.mrf.mxu0  ;;  %v1922_v5 = vpop.f32.mrf.mxu1  ;;  %3934 = vmatmul.mubr.bf16.vlgmr.msra.gmra.mxu1 %v4934_v34 }
 0x10f   : > { %v1812_v6 = vadd.f32 %v1811_v2, %v5204_v55  ;;  %v5217_v8 = vadd.f32 %v1922_v5, %v1810_v0  ;;  %3937 = vmatprep.mubr.bf16.mxu1 %v4971_v50  ;;  %3822 = vmatpush3.bf16.msra.mxu1 %v4344_v59  ;;  %v4348_v50 = vld [vmem:[%s5701_s3 + $0x28] sm:$0xff]   ;;  %v4357_v59 = vld [vmem:[%s5701_s3 + $0x40] sm:$0xff]  }
 0x110   : > { %v5223_v13 = vpop.f32.mrf.mxu0  ;;  %v1924_v15 = vpop.f32.mrf.mxu1  ;;  %3823 = vmatprep.subr.bf16.mxu1 %v4345_v62 }
 0x111   : > { %v5228_v22 = vadd.f32 %v1924_v15, %v1812_v6 }
 0x112   : > { %v5230_v23 = vpop.f32.mrf.mxu0  ;;  %v5232_v34 = vpop.f32.mrf.mxu1 }
 0x113   : > { %3824 = vmatpush3.bf16.msra.mxu1 %v4346_v10 }
 0x114   : > { %v1819_v11 = vpop.f32.mrf.mxu0  ;;  %v5237_v12 = vpop.f32.mrf.mxu1  ;;  %2462 = vmatmul.mubr.bf16.gmra.mxu0 %v4921_v28  ;;  %3825 = vmatprep.subr.bf16.mxu1 %v4347_v18  ;;  %v4350_v28 = vld [vmem:[%s5701_s3 + $0x20] sm:$0xff]  }
 0x115   : > { %v1820_v16 = vadd.f32 %v1819_v11, %v5201_v53  ;;  %2469 = vmatprep.mubr.bf16.mxu0 %v4928_v32  ;;  %v4351_v32 = vld [vmem:[%s5701_s3 + $0x58] sm:$0xff]  }
 0x116   : > { %v1821_v17 = vpop.f32.mrf.mxu0  ;;  %v1932_v21 = vpop.f32.mrf.mxu1  ;;  %3938 = vmatmul.mubr.bf16.gmra.mxu1 %v5008_v7 }
 0x117   : > { %v1822_v24 = vadd.f32 %v1821_v17, %v5204_v55  ;;  %v5247_v25 = vadd.f32 %v1932_v21, %v1820_v16  ;;  %3941 = vmatprep.mubr.bf16.mxu1 %v5048_v27  ;;  %3826 = vmatpush3.bf16.msra.mxu1 %v4348_v50  ;;  %v4352_v27 = vld [vmem:[%s5701_s3 + $0x18] sm:$0xff]  }
 0x118   : > { %v5253_v46 = vpop.f32.mrf.mxu0  ;;  %v1934_v49 = vpop.f32.mrf.mxu1  ;;  %3827 = vmatprep.subr.bf16.mxu1 %v4349_v14 }
 0x119   : > { %v5258_v7 = vadd.f32 %v1934_v49, %v1822_v24 }
 0x11a   : > { %v5260_v52 = vpop.f32.mrf.mxu0  ;;  %v5262_v20 = vpop.f32.mrf.mxu1 }
 0x11b   : > { %3828 = vmatpush3.bf16.msra.mxu1 %v4350_v28 }
 0x11c   : > { %v1829_v54 = vpop.f32.mrf.mxu0  ;;  %v5267_v56 = vpop.f32.mrf.mxu1  ;;  %2470 = vmatmul.mubr.bf16.gmra.mxu0 %v4958_v45  ;;  %3829 = vmatprep.subr.bf16.mxu1 %v4351_v32  ;;  %v4354_v45 = vld [vmem:[%s5701_s3 + $0x10] sm:$0xff]  }
 0x11d   : > { %v1830_v58 = vadd.f32 %v1829_v54, %v5201_v53  ;;  %2477 = vmatprep.mubr.bf16.mxu0 %v4965_v48  ;;  %v4355_v48 = vld [vmem:[%s5701_s3 + $0x48] sm:$0xff]  }
 0x11e   : > { %v1831_v60 = vpop.f32.mrf.mxu0  ;;  %v1942_v29 = vpop.f32.mrf.mxu1  ;;  %3942 = vmatmul.mubr.bf16.gmra.mxu1 %v5061_v36 }
 0x11f   : > { %v1832_v1 = vadd.f32 %v1831_v60, %v5204_v55  ;;  %v5277_v4 = vadd.f32 %v1942_v29, %v1830_v58  ;;  %3945 = vmatprep.mubr.bf16.mxu1 %v5074_v40  ;;  %3830 = vmatpush3.bf16.msra.mxu1 %v4352_v27  ;;  %v4356_v40 = vld [vmem:[%s5701_s3 + $0x8] sm:$0xff]  }
 0x120   : > { %v5283_v31 = vpop.f32.mrf.mxu0  ;;  %v1944_v9 = vpop.f32.mrf.mxu1  ;;  %3831 = vmatprep.subr.bf16.mxu1 %v4353_v57 }
 0x121   : > { %v5288_v36 = vadd.f32 %v1944_v9, %v1832_v1 }
 0x122   : > { %v5290_v35 = vpop.f32.mrf.mxu0  ;;  %v5292_v39 = vpop.f32.mrf.mxu1 }
 0x123   : > { %3832 = vmatpush3.bf16.msra.mxu1 %v4354_v45 }
 0x124   : > { %v1839_v43 = vpop.f32.mrf.mxu0  ;;  %v5297_v51 = vpop.f32.mrf.mxu1  ;;  %2478 = vmatmul.mubr.bf16.gmra.mxu0 %v4995_v63  ;;  %3833 = vmatprep.subr.bf16.mxu1 %v4355_v48  ;;  %v4358_v63 = vld [vmem:[%s5701_s3] sm:$0xff]  }
 0x125   : > { %v1840_v61 = vadd.f32 %v1839_v43, %v5201_v53  ;;  %2485 = vmatprep.mubr.bf16.mxu0 %v5002_v3 }
 0x126   : > { %v1841_v62 = vpop.f32.mrf.mxu0  ;;  %v1952_v0 = vpop.f32.mrf.mxu1  ;;  %3946 = vmatmul.mubr.bf16.gmra.mxu1 %v5084_v44 }
 0x127   : > { %v1842_v2 = vadd.f32 %v1841_v62, %v5204_v55  ;;  %v5307_v5 = vadd.f32 %v1952_v0, %v1840_v61  ;;  %3834 = vmatpush3.bf16.msra.mxu1 %v4356_v40 }
 0x128   : > { %v5312_v6 = vpop.f32.mrf.mxu0  ;;  %v1954_v10 = vpop.f32.mrf.mxu1  ;;  %3835 = vmatprep.subr.bf16.mxu1 %v4357_v59 }
 0x129   : > { %v5314_v15 = vadd.f32 %v1954_v10, %v1842_v2  ;;  %v4359_v2 = vld [vmem:[%s5701_s3 + $0xb8] sm:$0xff]  }
 0x12a   : > { %v5316_v3 = vpop.f32.mrf.mxu0  ;;  %v5318_v18 = vpop.f32.mrf.mxu1  ;;  %3949 = vmatprep.subr.bf16.mxu0 %v4359_v2 }
 0x12b   : > { %3836 = vmatpush3.bf16.msra.mxu1 %v4358_v63  ;;  %3950 = vmatpush3.bf16.msra.mxu0 %v4359_v2  ;;  %v1816_v2 = vadd.f32 %v5230_v23, %v5204_v55 }
 0x12c   : > { %v1849_v44 = vpop.f32.mrf.mxu0  ;;  %v5320_v50 = vpop.f32.mrf.mxu1  ;;  %2486 = vmatmul.mubr.bf16.gmra.mxu0 %v5032_v19 }
 0x12d   : > { %v1850_v11 = vadd.f32 %v1849_v44, %v5201_v53  ;;  %2493 = vmatprep.mubr.bf16.mxu0 %v5045_v26 }
 0x12e   : > { %v1851_v14 = vpop.f32.mrf.mxu0  ;;  %v1962_v16 = vpop.f32.mrf.mxu1 }
 0x12f   : > { %v1852_v17 = vadd.f32 %v1851_v14, %v5204_v55  ;;  %v5326_v21 = vadd.f32 %v1962_v16, %v1850_v11 }
 0x130   : > { %v5328_v24 = vpop.f32.mrf.mxu0  ;;  %v1964_v28 = vpop.f32.mrf.mxu1 }
 0x131   : > { %v5330_v49 = vadd.f32 %v1964_v28, %v1852_v17 }
 0x132   : > { %v5332_v32 = vpop.f32.mrf.mxu0  ;;  %v5334_v27 = vpop.f32.mrf.mxu1 }
 0x134   : > { %v1859_v19 = vpop.f32.mrf.mxu0  ;;  %v5336_v54 = vpop.f32.mrf.mxu1  ;;  %2494 = vmatmul.mubr.bf16.gmra.mxu0 %v5055_v30 }
 0x135   : > { %v1860_v26 = vadd.f32 %v1859_v19, %v5201_v53  ;;  %2501 = vmatprep.mubr.bf16.mxu0 %v5058_v33 }
 0x136   : > { %v1861_v57 = vpop.f32.mrf.mxu0  ;;  %v1972_v58 = vpop.f32.mrf.mxu1 }
 0x137   : > { %v1862_v60 = vadd.f32 %v1861_v57, %v5204_v55  ;;  %v5342_v29 = vadd.f32 %v1972_v58, %v1860_v26  ;;  %v4360_v57 = vld [vmem:[%s5701_s3 + $0xb0] sm:$0xff]  }
 0x138   : > { %v5344_v1 = vpop.f32.mrf.mxu0  ;;  %v1974_v45 = vpop.f32.mrf.mxu1  ;;  %3951 = vmatprep.subr.bf16.mxu0 %v4360_v57 }
 0x139   : > { %v5346_v9 = vadd.f32 %v1974_v45, %v1862_v60  ;;  %3952 = vmatpush3.bf16.msra.mxu0 %v4360_v57 }
 0x13a   : > { %v5348_v48 = vpop.f32.mrf.mxu0  ;;  %v5350_v40 = vpop.f32.mrf.mxu1 }
 0x13c   : > { %v1869_v30 = vpop.f32.mrf.mxu0  ;;  %v5352_v43 = vpop.f32.mrf.mxu1  ;;  %2502 = vmatmul.mubr.bf16.gmra.mxu0 %v5067_v37 }
 0x13d   : > { %v1870_v33 = vadd.f32 %v1869_v30, %v5201_v53  ;;  %2509 = vmatprep.mubr.bf16.mxu0 %v5071_v38 }
 0x13e   : > { %v1871_v59 = vpop.f32.mrf.mxu0  ;;  %v1982_v61 = vpop.f32.mrf.mxu1 }
 0x13f   : > { %v1872_v62 = vadd.f32 %v1871_v59, %v5204_v55  ;;  %v5358_v0 = vadd.f32 %v1982_v61, %v1870_v33  ;;  %v1814_v33 = vadd.f32 %v5223_v13, %v5201_v53  ;;  %v4361_v59 = vld [vmem:[%s5701_s3 + $0xa8] sm:$0xff]   ;;  %v4362_v13 = vld [vmem:[%s5701_s3 + $0xa0] sm:$0xff]  }
 0x140   : > { %v5363_v63 = vpop.f32.mrf.mxu0  ;;  %v1984_v10 = vpop.f32.mrf.mxu1  ;;  %3953 = vmatprep.subr.bf16.mxu0 %v4361_v59 }
 0x141   : > { %v5365_v44 = vadd.f32 %v1984_v10, %v1872_v62  ;;  %3954 = vmatpush3.bf16.msra.mxu0 %v4361_v59 }
 0x142   : > { %v5367_v37 = vpop.f32.mrf.mxu0  ;;  %v5369_v11 = vpop.f32.mrf.mxu1  ;;  %3955 = vmatprep.subr.bf16.mxu0 %v4362_v13 }
 0x144   : > { %v1879_v38 = vpop.f32.mrf.mxu0  ;;  %v5371_v14 = vpop.f32.mrf.mxu1  ;;  %2510 = vmatmul.mubr.bf16.gmra.mxu0 %v5080_v42 }
 0x145   : > { %v1880_v16 = vadd.f32 %v1879_v38, %v5201_v53  ;;  %3956 = vmatpush3.bf16.msra.mxu0 %v4362_v13 }
 0x146   : > { %v1881_v17 = vpop.f32.mrf.mxu0  ;;  %v1992_v28 = vpop.f32.mrf.mxu1 }
 0x147   : > { %v1882_v19 = vadd.f32 %v1881_v17, %v5204_v55  ;;  %v5376_v26 = vadd.f32 %v1992_v28, %v1880_v16  ;;  %v1927_v16 = vadd.f32 %v5232_v34, %v1814_v33  ;;  %v1824_v34 = vadd.f32 %v5253_v46, %v5201_v53 }
 0x148   : > { %v5381_v58 = vpop.f32.mrf.mxu0  ;;  %v1994_v60 = vpop.f32.mrf.mxu1 }
 0x149   : > { %v5383_v45 = vadd.f32 %v1994_v60, %v1882_v19  ;;  %v1929_v60 = vadd.f32 %v5237_v12, %v1816_v2  ;;  %v1826_v12 = vadd.f32 %v5260_v52, %v5204_v55  ;;  %v1937_v46 = vadd.f32 %v5262_v20, %v1824_v34 }
 0x14a   : > { %v5385_v30 = vpop.f32.mrf.mxu0  ;;  %v5387_v42 = vpop.f32.mrf.mxu1 }
 0x14c   : > { %v5394_v61 = vpop.f32.mrf.mxu1  ;;  %v2035_v62 = vpop.f32.mrf.mxu0 }
 0x14d   : > { %5710 = vst [vmem:[#allocation4_spill] sm:$0xff] %v5394_v61  ;;  %v2036_v28 = vadd.f32 %v2035_v62, %v5217_v8 }
 0x14e   : > { %v2037_v10 = vpop.f32.mrf.mxu0  ;;  %v2148_v38 = vpop.f32.mrf.mxu1 }
 0x14f   : > { %v2038_v17 = vadd.f32 %v2037_v10, %v5228_v22  ;;  %v4363_v10 = vld [vmem:[%s5701_s3 + $0x98] sm:$0xff]   ;;  %v2149_v8 = vadd.f32 %v2148_v38, %v2036_v28  ;;  %v4364_v38 = vld [vmem:[%s5701_s3 + $0x90] sm:$0xff]  }
 0x150   : > { %v2039_v19 = vpop.f32.mrf.mxu0  ;;  %v2150_v57 = vpop.f32.mrf.mxu1  ;;  %3957 = vmatprep.subr.bf16.mxu0 %v4363_v10 }
 0x151   : > { %v2040_v47 = vadd.f32 %v2039_v19, %v1927_v16  ;;  %v2151_v33 = vadd.f32 %v2150_v57, %v2038_v17  ;;  %3958 = vmatpush3.bf16.msra.mxu0 %v4363_v10  ;;  %v2615_v28 = vmax.f32 %v2149_v8, 0.0 }
 0x152   : > { %v2041_v23 = vpop.f32.mrf.mxu0  ;;  %v2152_v41 = vpop.f32.mrf.mxu1  ;;  %3959 = vmatprep.subr.bf16.mxu0 %v4364_v38 }
 0x153   : > { %v2042_v22 = vadd.f32 %v2041_v23, %v1929_v60  ;;  %v2153_v59 = vadd.f32 %v2152_v41, %v2040_v47  ;;  %v2616_v17 = vmax.f32 %v2151_v33, 0.0  ;;  %v1939_v60 = vadd.f32 %v5267_v56, %v1826_v12 }
 0x154   : > { %v2045_v62 = vpop.f32.mrf.mxu0  ;;  %v2154_v61 = vpop.f32.mrf.mxu1  ;;  %v1836_v12 = vadd.f32 %v5290_v35, %v5204_v55 }
 0x155   : > { %v2155_v2 = vadd.f32 %v2154_v61, %v2042_v22  ;;  %v2618_v16 = vmax.f32 %v2153_v59, 0.0  ;;  %v2046_v57 = vadd.f32 %v2045_v62, %v5247_v25  ;;  %3960 = vmatpush3.bf16.msra.mxu0 %v4364_v38  ;;  %v4365_v25 = vld [vmem:[%s5701_s3 + $0x88] sm:$0xff]  }
 0x156   : > { %v2047_v13 = vpop.f32.mrf.mxu0  ;;  %v2158_v19 = vpop.f32.mrf.mxu1  ;;  %3961 = vmatprep.subr.bf16.mxu0 %v4365_v25 }
 0x157   : > { %v2619_v41 = vmax.f32 %v2155_v2, 0.0  ;;  %v2048_v47 = vadd.f32 %v2047_v13, %v5258_v7  ;;  %v2663_v59 = vpack.c.bf16 %v2618_v16, %v2615_v28  ;;  %v1834_v7 = vadd.f32 %v5283_v31, %v5201_v53 }
 0x158   : > { %v2049_v52 = vpop.f32.mrf.mxu0  ;;  %v2160_v61 = vpop.f32.mrf.mxu1  ;;  %v2159_v8 = vadd.f32 %v2158_v19, %v2046_v57  ;;  %v4366_v19 = vld [vmem:[%s5701_s3 + $0x80] sm:$0xff]  }
 0x159   : > { %v2050_v23 = vadd.f32 %v2049_v52, %v1937_v46  ;;  %v2664_v22 = vpack.c.bf16 %v2619_v41, %v2616_v17  ;;  %v2161_v33 = vadd.f32 %v2160_v61, %v2048_v47  ;;  %3962 = vmatpush3.bf16.msra.mxu0 %v4365_v25  ;;  %v1947_v17 = vadd.f32 %v5292_v39, %v1834_v7 }
 0x15a   : > { %v2051_v20 = vpop.f32.mrf.mxu0  ;;  %v2162_v34 = vpop.f32.mrf.mxu1  ;;  %v2621_v28 = vmax.f32 %v2159_v8, 0.0  ;;  %v1949_v61 = vadd.f32 %v5297_v51, %v1836_v12  ;;  %3963 = vmatprep.subr.bf16.mxu0 %v4366_v19  ;;  %v1846_v51 = vadd.f32 %v5316_v3, %v5204_v55 }
 0x15b   : > { %v2052_v10 = vadd.f32 %v2051_v20, %v1939_v60  ;;  %v2163_v2 = vadd.f32 %v2162_v34, %v2050_v23  ;;  %2918 = vmatprep.mubr.bf16.mxu1 %v2664_v22  ;;  %v2622_v41 = vmax.f32 %v2161_v33, 0.0 }
 0x15c   : > { %v2055_v56 = vpop.f32.mrf.mxu0  ;;  %v2164_v62 = vpop.f32.mrf.mxu1  ;;  %2919 = vmatmul.mubr.bf16.vlgmr.msra.gmra.mxu1 %v2663_v59 }
 0x15d   : > { %v2165_v16 = vadd.f32 %v2164_v62, %v2052_v10  ;;  %v2624_v13 = vmax.f32 %v2163_v2, 0.0  ;;  %v2056_v57 = vadd.f32 %v2055_v56, %v5277_v4  ;;  %3964 = vmatpush3.bf16.msra.mxu0 %v4366_v19 }
 0x15e   : > { %v2057_v46 = vpop.f32.mrf.mxu0  ;;  %v2168_v31 = vpop.f32.mrf.mxu1 }
 0x15f   : > { %v2625_v47 = vmax.f32 %v2165_v16, 0.0  ;;  %v2058_v38 = vadd.f32 %v2057_v46, %v5288_v36  ;;  %v2666_v22 = vpack.c.bf16 %v2624_v13, %v2621_v28  ;;  %v1844_v36 = vadd.f32 %v5312_v6, %v5201_v53 }
 0x160   : > { %v2059_v35 = vpop.f32.mrf.mxu0  ;;  %v2170_v52 = vpop.f32.mrf.mxu1  ;;  %v2169_v33 = vadd.f32 %v2168_v31, %v2056_v57  ;;  %v1854_v57 = vadd.f32 %v5328_v24, %v5201_v53 }
 0x161   : > { %v2060_v60 = vadd.f32 %v2059_v35, %v1947_v17  ;;  %v2667_v23 = vpack.c.bf16 %v2625_v47, %v2622_v41  ;;  %v2171_v20 = vadd.f32 %v2170_v52, %v2058_v38  ;;  %v1957_v62 = vadd.f32 %v5318_v18, %v1844_v36 }
 0x162   : > { %v2061_v39 = vpop.f32.mrf.mxu0  ;;  %v2172_v59 = vpop.f32.mrf.mxu1  ;;  %v2627_v13 = vmax.f32 %v2169_v33, 0.0  ;;  %v1959_v41 = vadd.f32 %v5320_v50, %v1846_v51 }
 0x163   : > { %v2062_v34 = vadd.f32 %v2061_v39, %v1949_v61  ;;  %v2173_v7 = vadd.f32 %v2172_v59, %v2060_v60  ;;  %2926 = vmatprep.mubr.bf16.mxu1 %v2667_v23  ;;  %v2628_v12 = vmax.f32 %v2171_v20, 0.0  ;;  %v1967_v59 = vadd.f32 %v5334_v27, %v1854_v57 }
 0x164   : > { %v2065_v4 = vpop.f32.mrf.mxu0  ;;  %v2174_v10 = vpop.f32.mrf.mxu1  ;;  %2927 = vmatmul.mubr.bf16.gmra.mxu1 %v2666_v22 }
 0x165   : > { %v2175_v2 = vadd.f32 %v2174_v10, %v2062_v34  ;;  %v2630_v25 = vmax.f32 %v2173_v7, 0.0  ;;  %v2066_v46 = vadd.f32 %v2065_v4, %v5307_v5  ;;  %v1856_v5 = vadd.f32 %v5332_v32, %v5204_v55 }
 0x166   : > { %v2067_v8 = vpop.f32.mrf.mxu0  ;;  %v2178_v56 = vpop.f32.mrf.mxu1 }
 0x167   : > { %v2631_v16 = vmax.f32 %v2175_v2, 0.0  ;;  %v2068_v6 = vadd.f32 %v2067_v8, %v5314_v15  ;;  %v2669_v3 = vpack.c.bf16 %v2630_v25, %v2627_v13  ;;  %v2179_v15 = vadd.f32 %v2178_v56, %v2066_v46 }
 0x168   : > { %v2069_v31 = vpop.f32.mrf.mxu0  ;;  %v2180_v17 = vpop.f32.mrf.mxu1  ;;  %v1969_v10 = vadd.f32 %v5336_v54, %v1856_v5  ;;  %v1864_v56 = vadd.f32 %v5344_v1, %v5201_v53 }
 0x169   : > { %v2670_v47 = vpack.c.bf16 %v2631_v16, %v2628_v12  ;;  %v2070_v38 = vadd.f32 %v2069_v31, %v1957_v62  ;;  %v2181_v18 = vadd.f32 %v2180_v17, %v2068_v6  ;;  %v2633_v34 = vmax.f32 %v2179_v15, 0.0 }
 0x16a   : > { %v2071_v19 = vpop.f32.mrf.mxu0  ;;  %v2182_v28 = vpop.f32.mrf.mxu1  ;;  %v1977_v17 = vadd.f32 %v5350_v40, %v1864_v56 }
 0x16b   : > { %v2072_v35 = vadd.f32 %v2071_v19, %v1959_v41  ;;  %v2183_v52 = vadd.f32 %v2182_v28, %v2070_v38  ;;  %2934 = vmatprep.mubr.bf16.mxu1 %v2670_v47  ;;  %v2634_v36 = vmax.f32 %v2181_v18, 0.0 }
 0x16c   : > { %v2075_v61 = vpop.f32.mrf.mxu0  ;;  %v2184_v60 = vpop.f32.mrf.mxu1  ;;  %2935 = vmatmul.mubr.bf16.gmra.mxu1 %v2669_v3 }
 0x16d   : > { %v2185_v50 = vadd.f32 %v2184_v60, %v2072_v35  ;;  %v2636_v23 = vmax.f32 %v2183_v52, 0.0  ;;  %v2076_v7 = vadd.f32 %v2075_v61, %v5326_v21  ;;  %v1866_v21 = vadd.f32 %v5348_v48, %v5204_v55 }
 0x16e   : > { %v2077_v22 = vpop.f32.mrf.mxu0  ;;  %v2188_v39 = vpop.f32.mrf.mxu1  ;;  %v1874_v61 = vadd.f32 %v5363_v63, %v5201_v53 }
 0x16f   : > { %v2637_v20 = vmax.f32 %v2185_v50, 0.0  ;;  %v2078_v24 = vadd.f32 %v2077_v22, %v5330_v49  ;;  %v2672_v32 = vpack.c.bf16 %v2636_v23, %v2633_v34  ;;  %v2189_v49 = vadd.f32 %v2188_v39, %v2076_v7 }
 0x170   : > { %v2079_v33 = vpop.f32.mrf.mxu0  ;;  %v2190_v4 = vpop.f32.mrf.mxu1  ;;  %v1979_v57 = vadd.f32 %v5352_v43, %v1866_v21 }
 0x171   : > { %v2673_v51 = vpack.c.bf16 %v2637_v20, %v2634_v36  ;;  %v2080_v2 = vadd.f32 %v2079_v33, %v1967_v59  ;;  %v2191_v27 = vadd.f32 %v2190_v4, %v2078_v24  ;;  %v2639_v38 = vmax.f32 %v2189_v49, 0.0 }
 0x172   : > { %v2081_v25 = vpop.f32.mrf.mxu0  ;;  %v2192_v8 = vpop.f32.mrf.mxu1  ;;  %v1987_v36 = vadd.f32 %v5369_v11, %v1874_v61 }
 0x173   : > { %v2082_v62 = vadd.f32 %v2081_v25, %v1969_v10  ;;  %v2193_v12 = vadd.f32 %v2192_v8, %v2080_v2  ;;  %2942 = vmatprep.mubr.bf16.mxu1 %v2673_v51  ;;  %v2640_v41 = vmax.f32 %v2191_v27, 0.0  ;;  %v1884_v8 = vadd.f32 %v5381_v58, %v5201_v53 }
 0x174   : > { %v2085_v16 = vpop.f32.mrf.mxu0  ;;  %v2194_v6 = vpop.f32.mrf.mxu1  ;;  %2943 = vmatmul.mubr.bf16.gmra.mxu1 %v2672_v32 }
 0x175   : > { %v2195_v54 = vadd.f32 %v2194_v6, %v2082_v62  ;;  %v2642_v13 = vmax.f32 %v2193_v12, 0.0  ;;  %v2086_v3 = vadd.f32 %v2085_v16, %v5342_v29  ;;  %v1876_v29 = vadd.f32 %v5367_v37, %v5204_v55 }
 0x176   : > { %v2087_v46 = vpop.f32.mrf.mxu0  ;;  %v2198_v31 = vpop.f32.mrf.mxu1  ;;  %v1997_v21 = vadd.f32 %v5387_v42, %v1884_v8 }
 0x177   : > { %v2643_v47 = vmax.f32 %v2195_v54, 0.0  ;;  %v2088_v1 = vadd.f32 %v2087_v46, %v5346_v9  ;;  %v2675_v48 = vpack.c.bf16 %v2642_v13, %v2639_v38  ;;  %v2199_v9 = vadd.f32 %v2198_v31, %v2086_v3 }
 0x178   : > { %v2089_v19 = vpop.f32.mrf.mxu0  ;;  %v2200_v28 = vpop.f32.mrf.mxu1  ;;  %v1989_v10 = vadd.f32 %v5371_v14, %v1876_v29 }
 0x179   : > { %v2676_v18 = vpack.c.bf16 %v2643_v47, %v2640_v41  ;;  %v2090_v35 = vadd.f32 %v2089_v19, %v1977_v17  ;;  %v2201_v40 = vadd.f32 %v2200_v28, %v2088_v1  ;;  %v2645_v34 = vmax.f32 %v2199_v9, 0.0  ;;  %v5711_v41 = vld [vmem:[#allocation4_spill] sm:$0xff] }
 0x17a   : > { %v2091_v52 = vpop.f32.mrf.mxu0  ;;  %v2202_v15 = vpop.f32.mrf.mxu1 }
 0x17b   : > { %v2092_v60 = vadd.f32 %v2091_v52, %v1979_v57  ;;  %v2203_v5 = vadd.f32 %v2202_v15, %v2090_v35  ;;  %2950 = vmatprep.mubr.bf16.mxu1 %v2676_v18  ;;  %v2646_v20 = vmax.f32 %v2201_v40, 0.0  ;;  %v5713_v52 = vld [vmem:[#allocation3_spill] sm:$0xff] }
 0x17c   : > { %v2095_v50 = vpop.f32.mrf.mxu0  ;;  %v2204_v23 = vpop.f32.mrf.mxu1  ;;  %2951 = vmatmul.mubr.bf16.gmra.mxu1 %v2675_v48 }
 0x17d   : > { %v2205_v43 = vadd.f32 %v2204_v23, %v2092_v60  ;;  %v2648_v22 = vmax.f32 %v2203_v5, 0.0  ;;  %v2096_v7 = vadd.f32 %v2095_v50, %v5358_v0  ;;  %v1886_v0 = vadd.f32 %v5385_v30, %v5204_v55  ;;  %v5712_v55 = vld [vmem:[#allocation2_spill] sm:$0xff] }
 0x17e   : > { %v2097_v39 = vpop.f32.mrf.mxu0  ;;  %v2208_v59 = vpop.f32.mrf.mxu1  ;;  %v586_v30 = vsub.s32 2, %v5712_v55 }
 0x17f   : > { %v2649_v24 = vmax.f32 %v2205_v43, 0.0  ;;  %v2098_v63 = vadd.f32 %v2097_v39, %v5365_v44  ;;  %v2678_v37 = vpack.c.bf16 %v2648_v22, %v2645_v34  ;;  %v2209_v44 = vadd.f32 %v2208_v59, %v2096_v7 }
 0x180   : > { %v2099_v33 = vpop.f32.mrf.mxu0  ;;  %v2210_v4 = vpop.f32.mrf.mxu1  ;;  %v1999_v47 = vadd.f32 %v5711_v41, %v1886_v0  ;;  %v5475_v15 = vrot.slane %v5713_v52, %v586_v30 }
 0x181   : > { %v2679_v51 = vpack.c.bf16 %v2649_v24, %v2646_v20  ;;  %v2100_v2 = vadd.f32 %v2099_v33, %v1987_v36  ;;  %v2211_v11 = vadd.f32 %v2210_v4, %v2098_v63  ;;  %v2651_v58 = vmax.f32 %v2209_v44, 0.0 }
 0x182   : > { %v2101_v32 = vpop.f32.mrf.mxu0  ;;  %v2212_v25 = vpop.f32.mrf.mxu1 }
 0x183   : > { %v2102_v56 = vadd.f32 %v2101_v32, %v1989_v10  ;;  %v2213_v27 = vadd.f32 %v2212_v25, %v2100_v2  ;;  %2958 = vmatprep.mubr.bf16.mxu1 %v2679_v51  ;;  %v2652_v54 = vmax.f32 %v2211_v11, 0.0 }
 0x184   : > { %v2105_v62 = vpop.f32.mrf.mxu0  ;;  %v2214_v12 = vpop.f32.mrf.mxu1  ;;  %2959 = vmatmul.mubr.bf16.gmra.mxu1 %v2678_v37 }
 0x185   : > { %v2215_v14 = vadd.f32 %v2214_v12, %v2102_v56  ;;  %v2654_v49 = vmax.f32 %v2213_v27, 0.0  ;;  %v2106_v46 = vadd.f32 %v2105_v62, %v5376_v26 }
 0x186   : > { %v2107_v16 = vpop.f32.mrf.mxu0  ;;  %v2218_v6 = vpop.f32.mrf.mxu1 }
 0x187   : > { %v2655_v13 = vmax.f32 %v2215_v14, 0.0  ;;  %v2108_v53 = vadd.f32 %v2107_v16, %v5383_v45  ;;  %v2681_v3 = vpack.c.bf16 %v2654_v49, %v2651_v58  ;;  %v2219_v35 = vadd.f32 %v2218_v6, %v2106_v46 }
 0x188   : > { %v2109_v31 = vpop.f32.mrf.mxu0  ;;  %v2220_v17 = vpop.f32.mrf.mxu1 }
 0x189   : > { %v2682_v1 = vpack.c.bf16 %v2655_v13, %v2652_v54  ;;  %v2110_v38 = vadd.f32 %v2109_v31, %v1997_v21  ;;  %v2221_v57 = vadd.f32 %v2220_v17, %v2108_v53  ;;  %v2657_v23 = vmax.f32 %v2219_v35, 0.0 }
 0x18a   : > { %v2111_v19 = vpop.f32.mrf.mxu0  ;;  %v2222_v28 = vpop.f32.mrf.mxu1 }
 0x18b   : > { %v2112_v42 = vadd.f32 %v2111_v19, %v1999_v47  ;;  %v2223_v18 = vadd.f32 %v2222_v28, %v2110_v38  ;;  %2966 = vmatprep.mubr.bf16.mxu1 %v2682_v1  ;;  %v2658_v5 = vmax.f32 %v2221_v57, 0.0 }
 0x18c   : > { %v2224_v45 = vpop.f32.mrf.mxu1  ;;  %v3629_v48 = vpop.f32.mrf.mxu0  ;;  %2967 = vmatmul.mubr.bf16.gmra.mxu1 %v2681_v3 }
 0x18d   : > { %v2225_v26 = vadd.f32 %v2224_v45, %v2112_v42  ;;  %v2660_v61 = vmax.f32 %v2223_v18, 0.0 }
 0x18e   : > { %v3630_v40 = vpop.f32.mrf.mxu0  ;;  %v3693_v60 = vpop.f32.mrf.mxu1 }
 0x18f   : > { %v2661_v9 = vmax.f32 %v2225_v26, 0.0  ;;  %v3631_v50 = vadd.f32 %v3630_v40, %v3629_v48  ;;  %v2684_v36 = vpack.c.bf16 %v2660_v61, %v2657_v23 }
 0x190   : > { %v5477_v29 = vpop.f32.mrf.mxu0  ;;  %v3694_v43 = vpop.f32.mrf.mxu1 }
 0x191   : > { %v2685_v22 = vpack.c.bf16 %v2661_v9, %v2658_v5  ;;  %v2262_v39 = vadd.f32 %v3631_v50, %v5475_v15  ;;  %v3695_v59 = vadd.f32 %v3694_v43, %v3693_v60 }
 0x192   : > { %v5480_v20 = vpop.f32.mrf.mxu0  ;;  %v5482_v24 = vpop.f32.mrf.mxu1 }
 0x193   : > { %v5484_v63 = vadd.f32 %v3695_v59, %v2262_v39  ;;  %2974 = vmatprep.mubr.bf16.mxu1 %v2685_v22 }
 0x194   : > { %v3635_v34 = vpop.f32.mrf.mxu0  ;;  %v5486_v7 = vpop.f32.mrf.mxu1  ;;  %2975 = vmatmul.mubr.bf16.gmra.mxu1 %v2684_v36 }
 0x196   : > { %v3636_v33 = vpop.f32.mrf.mxu0  ;;  %v3699_v4 = vpop.f32.mrf.mxu1 }
 0x197   : > { %v3637_v10 = vadd.f32 %v3636_v33, %v3635_v34 }
 0x198   : > { %v5488_v51 = vpop.f32.mrf.mxu0  ;;  %v3700_v2 = vpop.f32.mrf.mxu1 }
 0x199   : > { %v2270_v37 = vadd.f32 %v3637_v10, %v5475_v15  ;;  %v3701_v32 = vadd.f32 %v3700_v2, %v3699_v4 }
 0x19a   : > { %v5491_v25 = vpop.f32.mrf.mxu0  ;;  %v5493_v8 = vpop.f32.mrf.mxu1 }
 0x19b   : > { %v5495_v11 = vadd.f32 %v3701_v32, %v2270_v37 }
 0x19c   : > { %v3641_v56 = vpop.f32.mrf.mxu0  ;;  %v5497_v27 = vpop.f32.mrf.mxu1 }
 0x19e   : > { %v3642_v44 = vpop.f32.mrf.mxu0  ;;  %v3705_v62 = vpop.f32.mrf.mxu1 }
 0x19f   : > { %v3643_v12 = vadd.f32 %v3642_v44, %v3641_v56 }
 0x1a0   : > { %v5499_v0 = vpop.f32.mrf.mxu0  ;;  %v3706_v14 = vpop.f32.mrf.mxu1 }
 0x1a1   : > { %v2278_v49 = vadd.f32 %v3643_v12, %v5475_v15  ;;  %v3707_v16 = vadd.f32 %v3706_v14, %v3705_v62 }
 0x1a2   : > { %v5502_v6 = vpop.f32.mrf.mxu0  ;;  %v5504_v21 = vpop.f32.mrf.mxu1 }
 0x1a3   : > { %v5506_v54 = vadd.f32 %v3707_v16, %v2278_v49 }
 0x1a4   : > { %v3647_v13 = vpop.f32.mrf.mxu0  ;;  %v5508_v53 = vpop.f32.mrf.mxu1 }
 0x1a6   : > { %v3648_v58 = vpop.f32.mrf.mxu0  ;;  %v3711_v46 = vpop.f32.mrf.mxu1 }
 0x1a7   : > { %v3649_v31 = vadd.f32 %v3648_v58, %v3647_v13 }
 0x1a8   : > { %v5510_v17 = vpop.f32.mrf.mxu0  ;;  %v3712_v41 = vpop.f32.mrf.mxu1 }
 0x1a9   : > { %v2286_v47 = vadd.f32 %v3649_v31, %v5475_v15  ;;  %v3713_v1 = vadd.f32 %v3712_v41, %v3711_v46 }
 0x1aa   : > { %v5513_v38 = vpop.f32.mrf.mxu0  ;;  %v5515_v55 = vpop.f32.mrf.mxu1 }
 0x1ab   : > { %v5517_v30 = vadd.f32 %v3713_v1, %v2286_v47 }
 0x1ac   : > { %v3653_v3 = vpop.f32.mrf.mxu0  ;;  %v5519_v19 = vpop.f32.mrf.mxu1 }
 0x1ae   : > { %v3654_v28 = vpop.f32.mrf.mxu0  ;;  %v3717_v57 = vpop.f32.mrf.mxu1 }
 0x1af   : > { %v3655_v42 = vadd.f32 %v3654_v28, %v3653_v3 }
 0x1b0   : > { %v5521_v18 = vpop.f32.mrf.mxu0  ;;  %v3718_v35 = vpop.f32.mrf.mxu1 }
 0x1b1   : > { %v2294_v45 = vadd.f32 %v3655_v42, %v5475_v15  ;;  %v3719_v48 = vadd.f32 %v3718_v35, %v3717_v57  ;;  %v3634_v42 = vadd.f32 %v5480_v20, %v5477_v29  ;;  %v3640_v20 = vadd.f32 %v5491_v25, %v5488_v51 }
 0x1b2   : > { %v5524_v26 = vpop.f32.mrf.mxu0  ;;  %v5526_v52 = vpop.f32.mrf.mxu1 }
 0x1b3   : > { %v5528_v61 = vadd.f32 %v3719_v48, %v2294_v45 }
 0x1b4   : > { %v3659_v40 = vpop.f32.mrf.mxu0  ;;  %v5530_v60 = vpop.f32.mrf.mxu1 }
 0x1b6   : > { %v3660_v5 = vpop.f32.mrf.mxu0  ;;  %v3723_v9 = vpop.f32.mrf.mxu1 }
 0x1b7   : > { %v3661_v50 = vadd.f32 %v3660_v5, %v3659_v40 }
 0x1b8   : > { %v5532_v23 = vpop.f32.mrf.mxu0  ;;  %v3724_v43 = vpop.f32.mrf.mxu1 }
 0x1b9   : > { %v2302_v22 = vadd.f32 %v3661_v50, %v5475_v15  ;;  %v3725_v39 = vadd.f32 %v3724_v43, %v3723_v9  ;;  %v2265_v9 = vadd.f32 %v3634_v42, %v5475_v15  ;;  %v3698_v50 = vadd.f32 %v5486_v7, %v5482_v24 }
 0x1ba   : > { %v5535_v59 = vpop.f32.mrf.mxu0  ;;  %v5537_v36 = vpop.f32.mrf.mxu1  ;;  %v3704_v24 = vadd.f32 %v5497_v27, %v5493_v8  ;;  %v4367_v8 = vld [vmem:[%s5703_s5 + $0x38] sm:$0xff]  }
 0x1bb   : > { %v5539_v34 = vadd.f32 %v3725_v39, %v2302_v22  ;;  %v2362_v29 = vadd.f32 %v3698_v50, %v2265_v9  ;;  %3981 = vmatprep.subr.bf16.mxu0 %v4367_v8  ;;  %4013 = vmatprep.subr.bf16.mxu1 %v4367_v8 }
 0x1bc   : > { %v3665_v33 = vpop.f32.mrf.mxu0  ;;  %v5541_v4 = vpop.f32.mrf.mxu1  ;;  %4021 = vmatpush3.bf16.msra.mxu1 %v4367_v8 }
 0x1be   : > { %v3666_v10 = vpop.f32.mrf.mxu0  ;;  %v3729_v2 = vpop.f32.mrf.mxu1 }
 0x1bf   : > { %v3667_v37 = vadd.f32 %v3666_v10, %v3665_v33 }
 0x1c0   : > { %v5543_v32 = vpop.f32.mrf.mxu0  ;;  %v3730_v56 = vpop.f32.mrf.mxu1 }
 0x1c1   : > { %v2310_v44 = vadd.f32 %v3667_v37, %v5475_v15  ;;  %v3731_v62 = vadd.f32 %v3730_v56, %v3729_v2 }
 0x1c2   : > { %v5546_v12 = vpop.f32.mrf.mxu0  ;;  %v5548_v14 = vpop.f32.mrf.mxu1 }
 0x1c3   : > { %v5550_v49 = vadd.f32 %v3731_v62, %v2310_v44 }
 0x1c4   : > { %v3671_v16 = vpop.f32.mrf.mxu0  ;;  %v5552_v13 = vpop.f32.mrf.mxu1 }
 0x1c6   : > { %v3672_v58 = vpop.f32.mrf.mxu0  ;;  %v3735_v46 = vpop.f32.mrf.mxu1 }
 0x1c7   : > { %v3673_v31 = vadd.f32 %v3672_v58, %v3671_v16 }
 0x1c8   : > { %v5554_v41 = vpop.f32.mrf.mxu0  ;;  %v3736_v47 = vpop.f32.mrf.mxu1 }
 0x1c9   : > { %v2318_v1 = vadd.f32 %v3673_v31, %v5475_v15  ;;  %v3737_v3 = vadd.f32 %v3736_v47, %v3735_v46  ;;  %v2273_v46 = vadd.f32 %v3640_v20, %v5475_v15 }
 0x1ca   : > { %v5557_v28 = vpop.f32.mrf.mxu0  ;;  %v5559_v57 = vpop.f32.mrf.mxu1 }
 0x1cb   : > { %v5563_v35 = vadd.f32 %v3737_v3, %v2318_v1  ;;  %v2370_v42 = vadd.f32 %v3704_v24, %v2273_v46 }
 0x1cc   : > { %v5565_v45 = vpop.f32.mrf.mxu1  ;;  %v3757_v48 = vpop.f32.mrf.mxu0 }
 0x1ce   : > { %v3758_v40 = vpop.f32.mrf.mxu0  ;;  %v3935_v5 = vpop.f32.mrf.mxu1 }
 0x1cf   : > { %v3759_v43 = vadd.f32 %v3758_v40, %v3757_v48  ;;  %v3646_v48 = vadd.f32 %v5502_v6, %v5499_v0  ;;  %v3710_v6 = vadd.f32 %v5508_v53, %v5504_v21 }
 0x1d0   : > { %v3760_v22 = vpop.f32.mrf.mxu0  ;;  %v2552_v39 = vpop.f32.mrf.mxu1 }
 0x1d1   : > { %v2456_v33 = vadd.f32 %v3759_v43, %v5484_v63  ;;  %v2281_v0 = vadd.f32 %v3646_v48, %v5475_v15 }
 0x1d2   : > { %v3761_v10 = vpop.f32.mrf.mxu0  ;;  %v3936_v2 = vpop.f32.mrf.mxu1 }
 0x1d3   : > { %v3762_v37 = vadd.f32 %v3761_v10, %v3760_v22  ;;  %v2553_v62 = vadd.f32 %v2552_v39, %v2456_v33 }
 0x1d4   : > { %v3763_v56 = vpop.f32.mrf.mxu0  ;;  %v2555_v44 = vpop.f32.mrf.mxu1 }
 0x1d5   : > { %v2459_v16 = vadd.f32 %v3762_v37, %v2362_v29  ;;  %v2617_v1 = vmax.f32 %v2553_v62, 0.0 }
 0x1d6   : > { %v3764_v58 = vpop.f32.mrf.mxu0  ;;  %v5576_v47 = vpop.f32.mrf.mxu1 }
 0x1d7   : > { %v3765_v7 = vadd.f32 %v3764_v58, %v3763_v56  ;;  %v2556_v31 = vadd.f32 %v2555_v44, %v2459_v16  ;;  %v3652_v44 = vadd.f32 %v5513_v38, %v5510_v17  ;;  %v4369_v16 = vld [vmem:[%s5703_s5 + $0x28] sm:$0xff]   ;;  %v2378_v58 = vadd.f32 %v3710_v6, %v2281_v0  ;;  %v4370_v17 = vld [vmem:[%s5703_s5 + $0x20] sm:$0xff]  }
 0x1d8   : > { %v3766_v63 = vpop.f32.mrf.mxu0  ;;  %v2568_v50 = vpop.f32.mrf.mxu1  ;;  %v3716_v38 = vadd.f32 %v5519_v19, %v5515_v55  ;;  %v4371_v55 = vld [vmem:[%s5703_s5 + $0x18] sm:$0xff]  }
 0x1d9   : > { %v2464_v3 = vadd.f32 %v3765_v7, %v5495_v11  ;;  %v2620_v51 = vmax.f32 %v2556_v31, 0.0  ;;  %v4368_v11 = vld [vmem:[%s5703_s5 + $0x30] sm:$0xff]  }
 0x1da   : > { %v3767_v25 = vpop.f32.mrf.mxu0  ;;  %v3940_v20 = vpop.f32.mrf.mxu1  ;;  %4014 = vmatprep.subr.bf16.mxu1 %v4368_v11 }
 0x1db   : > { %v2665_v40 = vpack.c.bf16 %v2620_v51, %v2617_v1  ;;  %v3768_v9 = vadd.f32 %v3767_v25, %v3766_v63  ;;  %v2561_v43 = vadd.f32 %v3935_v5, %v2464_v3  ;;  %4022 = vmatpush3.bf16.msra.mxu1 %v4368_v11 }
 0x1dc   : > { %v3769_v27 = vpop.f32.mrf.mxu0  ;;  %v2571_v46 = vpop.f32.mrf.mxu1  ;;  %4015 = vmatprep.subr.bf16.mxu1 %v4369_v16 }
 0x1dd   : > { %v2467_v22 = vadd.f32 %v3768_v9, %v2370_v42  ;;  %3965 = vmatprep.mubr.bf16.mxu0 %v2665_v40  ;;  %v2623_v5 = vmax.f32 %v2561_v43, 0.0  ;;  %v3658_v40 = vadd.f32 %v5524_v26, %v5521_v18 }
 0x1de   : > { %v3770_v39 = vpop.f32.mrf.mxu0  ;;  %v5602_v51 = vpop.f32.mrf.mxu1 }
 0x1df   : > { %v2564_v33 = vadd.f32 %v3936_v2, %v2467_v22  ;;  %v3771_v10 = vadd.f32 %v3770_v39, %v3769_v27  ;;  %4023 = vmatpush3.bf16.msra.mxu1 %v4369_v16  ;;  %v2297_v18 = vadd.f32 %v3658_v40, %v5475_v15  ;;  %v3722_v39 = vadd.f32 %v5530_v60, %v5526_v52 }
 0x1e0   : > { %v3772_v29 = vpop.f32.mrf.mxu0  ;;  %4016 = vmatprep.subr.bf16.mxu1 %v4370_v17  ;;  %v2584_v43 = vpop.f32.mrf.mxu1 }
 0x1e1   : > { %v2626_v37 = vmax.f32 %v2564_v33, 0.0  ;;  %v2472_v56 = vadd.f32 %v3771_v10, %v5506_v54  ;;  %v2289_v54 = vadd.f32 %v3652_v44, %v5475_v15 }
 0x1e2   : > { %v3773_v62 = vpop.f32.mrf.mxu0  ;;  %v3944_v33 = vpop.f32.mrf.mxu1 }
 0x1e3   : > { %v2668_v21 = vpack.c.bf16 %v2626_v37, %v2623_v5  ;;  %v3774_v53 = vadd.f32 %v3773_v62, %v3772_v29  ;;  %v2569_v24 = vadd.f32 %v2568_v50, %v2472_v56  ;;  %v2386_v19 = vadd.f32 %v3716_v38, %v2289_v54  ;;  %4024 = vmatpush3.bf16.msra.mxu1 %v4370_v17 }
 0x1e4   : > { %v3775_v2 = vpop.f32.mrf.mxu0  ;;  %4017 = vmatprep.subr.bf16.mxu1 %v4371_v55  ;;  %v2394_v37 = vadd.f32 %v3722_v39, %v2297_v18  ;;  %v3664_v56 = vadd.f32 %v5535_v59, %v5532_v23  ;;  %v2587_v60 = vpop.f32.mrf.mxu1  ;;  %v3740_v39 = vadd.f32 %v5565_v45, %v5559_v57  ;;  %v4372_v57 = vld [vmem:[%s5703_s5 + $0x10] sm:$0xff]   ;;  %v4374_v45 = vld [vmem:[%s5703_s5] sm:$0xff]  }
 0x1e5   : > { %3966 = vmatmul.mubr.bf16.vlgmr.msra.gmra.mxu0 %v2668_v21  ;;  %v2475_v7 = vadd.f32 %v3774_v53, %v2378_v58  ;;  %v2629_v25 = vmax.f32 %v2569_v24, 0.0 }
 0x1e6   : > { %v3776_v31 = vpop.f32.mrf.mxu0  ;;  %3982 = vmatpush3.bf16.msra.mxu0 %v4367_v8  ;;  %v2305_v21 = vadd.f32 %v3664_v56, %v5475_v15  ;;  %v3947_v24 = vpop.f32.mrf.mxu1 }
 0x1e7   : > { %v3777_v63 = vadd.f32 %v3776_v31, %v3775_v2  ;;  %v2572_v1 = vadd.f32 %v2571_v46, %v2475_v7  ;;  %3983 = vmatprep.subr.bf16.mxu0 %v4368_v11  ;;  %4025 = vmatpush3.bf16.msra.mxu1 %v4371_v55 }
 0x1e8   : > { %v3778_v3 = vpop.f32.mrf.mxu0  ;;  %4018 = vmatprep.subr.bf16.mxu1 %v4372_v57 }
 0x1e9   : > { %v2480_v42 = vadd.f32 %v3777_v63, %v5517_v30  ;;  %v2632_v48 = vmax.f32 %v2572_v1, 0.0 }
 0x1ea   : > { %v3779_v9 = vpop.f32.mrf.mxu0  ;;  %3984 = vmatpush3.bf16.msra.mxu0 %v4368_v11 }
 0x1eb   : > { %v2671_v8 = vpack.c.bf16 %v2632_v48, %v2629_v25  ;;  %v3780_v27 = vadd.f32 %v3779_v9, %v3778_v3  ;;  %3985 = vmatprep.subr.bf16.mxu0 %v4369_v16  ;;  %v2577_v30 = vadd.f32 %v5576_v47, %v2480_v42  ;;  %v2600_v3 = vpop.f32.mrf.mxu1  ;;  %4026 = vmatpush3.bf16.msra.mxu1 %v4372_v57 }
 0x1ec   : > { %v3781_v50 = vpop.f32.mrf.mxu0 }
 0x1ed   : > { %v2483_v22 = vadd.f32 %v3780_v27, %v2386_v19  ;;  %3969 = vmatprep.mubr.bf16.mxu0 %v2671_v8  ;;  %v2635_v10 = vmax.f32 %v2577_v30, 0.0 }
 0x1ee   : > { %v3782_v26 = vpop.f32.mrf.mxu0  ;;  %3986 = vmatpush3.bf16.msra.mxu0 %v4369_v16 }
 0x1ef   : > { %v2580_v11 = vadd.f32 %v3940_v20, %v2483_v22  ;;  %v3783_v0 = vadd.f32 %v3782_v26, %v3781_v50  ;;  %3987 = vmatprep.subr.bf16.mxu0 %v4370_v17 }
 0x1f0   : > { %v3784_v6 = vpop.f32.mrf.mxu0 }
 0x1f1   : > { %v2638_v29 = vmax.f32 %v2580_v11, 0.0  ;;  %v2488_v5 = vadd.f32 %v3783_v0, %v5528_v61  ;;  %v3728_v61 = vadd.f32 %v5541_v4, %v5537_v36 }
 0x1f2   : > { %v3785_v47 = vpop.f32.mrf.mxu0  ;;  %3988 = vmatpush3.bf16.msra.mxu0 %v4370_v17  ;;  %v3670_v17 = vadd.f32 %v5546_v12, %v5543_v32 }
 0x1f3   : > { %v2674_v44 = vpack.c.bf16 %v2638_v29, %v2635_v10  ;;  %v3786_v62 = vadd.f32 %v3785_v47, %v3784_v6  ;;  %3989 = vmatprep.subr.bf16.mxu0 %v4371_v55  ;;  %v2585_v20 = vadd.f32 %v2584_v43, %v2488_v5  ;;  %v2402_v31 = vadd.f32 %v3728_v61, %v2305_v21 }
 0x1f4   : > { %v3787_v52 = vpop.f32.mrf.mxu0  ;;  %v2313_v42 = vadd.f32 %v3670_v17, %v5475_v15 }
 0x1f5   : > { %3970 = vmatmul.mubr.bf16.gmra.mxu0 %v2674_v44  ;;  %v2491_v16 = vadd.f32 %v3786_v62, %v2394_v37  ;;  %v2641_v23 = vmax.f32 %v2585_v20, 0.0 }
 0x1f6   : > { %v3788_v58 = vpop.f32.mrf.mxu0  ;;  %3990 = vmatpush3.bf16.msra.mxu0 %v4371_v55  ;;  %v3948_v55 = vpop.f32.mrf.mxu1 }
 0x1f7   : > { %v3789_v53 = vadd.f32 %v3788_v58, %v3787_v52  ;;  %v2588_v2 = vadd.f32 %v2587_v60, %v2491_v16  ;;  %3991 = vmatprep.subr.bf16.mxu0 %v4372_v57 }
 0x1f8   : > { %v3790_v46 = vpop.f32.mrf.mxu0  ;;  %v2603_v22 = vpop.f32.mrf.mxu1 }
 0x1f9   : > { %v2496_v59 = vadd.f32 %v3789_v53, %v5539_v34  ;;  %v2644_v7 = vmax.f32 %v2588_v2, 0.0  ;;  %v3734_v34 = vadd.f32 %v5552_v13, %v5548_v14 }
 0x1fa   : > { %v3791_v54 = vpop.f32.mrf.mxu0  ;;  %3992 = vmatpush3.bf16.msra.mxu0 %v4372_v57 }
 0x1fb   : > { %v2677_v38 = vpack.c.bf16 %v2644_v7, %v2641_v23  ;;  %v3792_v63 = vadd.f32 %v3791_v54, %v3790_v46  ;;  %v2593_v25 = vadd.f32 %v5602_v51, %v2496_v59  ;;  %v2410_v27 = vadd.f32 %v3734_v34, %v2313_v42  ;;  %v5650_v42 = vld [vmem:[%s5702_s4] ss:$0 sm:$0xff] }
 0x1fc   : > { %v3793_v1 = vpop.f32.mrf.mxu0  ;;  %v3676_v51 = vadd.f32 %v5557_v28, %v5554_v41 }
 0x1fd   : > { %v2499_v36 = vadd.f32 %v3792_v63, %v2402_v31  ;;  %3973 = vmatprep.mubr.bf16.mxu0 %v2677_v38  ;;  %v2647_v19 = vmax.f32 %v2593_v25, 0.0 }
 0x1fe   : > { %v3794_v4 = vpop.f32.mrf.mxu0  ;;  %v2321_v26 = vadd.f32 %v3676_v51, %v5475_v15 }
 0x1ff   : > { %v2596_v48 = vadd.f32 %v3944_v33, %v2499_v36  ;;  %v3795_v40 = vadd.f32 %v3794_v4, %v3793_v1 }
 0x200   : > { %v3796_v9 = vpop.f32.mrf.mxu0  ;;  %v2418_v10 = vadd.f32 %v3740_v39, %v2321_v26 }
 0x201   : > { %v2650_v32 = vmax.f32 %v2596_v48, 0.0  ;;  %v2504_v12 = vadd.f32 %v3795_v40, %v5550_v49 }
 0x202   : > { %v3797_v8 = vpop.f32.mrf.mxu0 }
 0x203   : > { %v2680_v50 = vpack.c.bf16 %v2650_v32, %v2647_v19  ;;  %v3798_v43 = vadd.f32 %v3797_v8, %v3796_v9  ;;  %v2601_v18 = vadd.f32 %v2600_v3, %v2504_v12 }
 0x204   : > { %v3799_v30 = vpop.f32.mrf.mxu0 }
 0x205   : > { %3974 = vmatmul.mubr.bf16.gmra.mxu0 %v2680_v50  ;;  %v2507_v14 = vadd.f32 %v3798_v43, %v2410_v27  ;;  %v2653_v6 = vmax.f32 %v2601_v18, 0.0 }
 0x206   : > { %v3800_v13 = vpop.f32.mrf.mxu0 }
 0x207   : > { %v3801_v11 = vadd.f32 %v3800_v13, %v3799_v30  ;;  %v2604_v49 = vadd.f32 %v2603_v22, %v2507_v14 }
 0x208   : > { %v3802_v0 = vpop.f32.mrf.mxu0 }
 0x209   : > { %v2512_v33 = vadd.f32 %v3801_v11, %v5563_v35  ;;  %v2656_v41 = vmax.f32 %v2604_v49, 0.0  ;;  %v4373_v35 = vld [vmem:[%s5703_s5 + $0x8] sm:$0xff]  }
 0x20a   : > { %v3803_v28 = vpop.f32.mrf.mxu0  ;;  %3993 = vmatprep.subr.bf16.mxu0 %v4373_v35  ;;  %4019 = vmatprep.subr.bf16.mxu1 %v4373_v35 }
 0x20b   : > { %v2683_v29 = vpack.c.bf16 %v2656_v41, %v2653_v6  ;;  %v3804_v5 = vadd.f32 %v3803_v28, %v3802_v0  ;;  %v2609_v47 = vadd.f32 %v3947_v24, %v2512_v33  ;;  %3994 = vmatpush3.bf16.msra.mxu0 %v4373_v35  ;;  %4027 = vmatpush3.bf16.msra.mxu1 %v4373_v35 }
 0x20c   : > { %3995 = vmatprep.subr.bf16.mxu0 %v4374_v45  ;;  %4020 = vmatprep.subr.bf16.mxu1 %v4374_v45 }
 0x20d   : > { %v2515_v37 = vadd.f32 %v3804_v5, %v2418_v10  ;;  %3977 = vmatprep.mubr.bf16.mxu0 %v2683_v29  ;;  %v2659_v44 = vmax.f32 %v2609_v47, 0.0 }
 0x20f   : > { %v2612_v56 = vadd.f32 %v3948_v55, %v2515_v37  ;;  %3996 = vmatpush3.bf16.msra.mxu0 %v4374_v45  ;;  %4028 = vmatpush3.bf16.msra.mxu1 %v4374_v45 }
 0x211   : > { %v2662_v15 = vmax.f32 %v2612_v56, 0.0 }
 0x213   : > { %v2686_v62 = vpack.c.bf16 %v2662_v15, %v2659_v44 }
 0x215   : > { %3978 = vmatmul.mubr.bf16.gmra.mxu0 %v2686_v62 }
 0x21c   : > { %v3837_v52 = vpop.f32.mrf.mxu1 }
 0x21e   : > { %v3838_v60 = vpop.f32.mrf.mxu1 }
 0x21f   : > { %v3839_v3 = vadd.f32 %v3838_v60, %v3837_v52 }
 0x220   : > { %v3840_v20 = vpop.f32.mrf.mxu1 }
 0x221   : > { %v2921_v9 = vadd.f32 %v3839_v3, %v5650_v42 }
 0x222   : > { %v3841_v16 = vpop.f32.mrf.mxu1 }
 0x223   : > { %v3842_v48 = vadd.f32 %v3841_v16, %v3840_v20 }
 0x224   : > { %v3843_v58 = vpop.f32.mrf.mxu1 }
 0x225   : > { %v2924_v51 = vadd.f32 %v3842_v48, %v5650_v42 }
 0x226   : > { %v3844_v21 = vpop.f32.mrf.mxu1 }
 0x227   : > { %v3845_v36 = vadd.f32 %v3844_v21, %v3843_v58 }
 0x228   : > { %v3846_v61 = vpop.f32.mrf.mxu1 }
 0x229   : > { %v2929_v32 = vadd.f32 %v3845_v36, %v5650_v42 }
 0x22a   : > { %v3847_v53 = vpop.f32.mrf.mxu1 }
 0x22b   : > { %v3848_v25 = vadd.f32 %v3847_v53, %v3846_v61 }
 0x22c   : > { %v3849_v2 = vpop.f32.mrf.mxu1 }
 0x22d   : > { %v2932_v55 = vadd.f32 %v3848_v25, %v5650_v42 }
 0x22e   : > { %v3850_v46 = vpop.f32.mrf.mxu1 }
 0x22f   : > { %v3851_v0 = vadd.f32 %v3850_v46, %v3849_v2 }
 0x230   : > { %v3852_v24 = vpop.f32.mrf.mxu1 }
 0x231   : > { %v2937_v5 = vadd.f32 %v3851_v0, %v5650_v42 }
 0x232   : > { %v3853_v23 = vpop.f32.mrf.mxu1 }
 0x233   : > { %v3854_v10 = vadd.f32 %v3853_v23, %v3852_v24 }
 0x234   : > { %v3855_v59 = vpop.f32.mrf.mxu1 }
 0x235   : > { %v2940_v57 = vadd.f32 %v3854_v10, %v5650_v42 }
 0x236   : > { %v3856_v7 = vpop.f32.mrf.mxu1 }
 0x237   : > { %v3857_v33 = vadd.f32 %v3856_v7, %v3855_v59 }
 0x238   : > { %v3858_v54 = vpop.f32.mrf.mxu1 }
 0x239   : > { %v2945_v56 = vadd.f32 %v3857_v33, %v5650_v42 }
 0x23a   : > { %v3859_v31 = vpop.f32.mrf.mxu1 }
 0x23b   : > { %v3860_v6 = vadd.f32 %v3859_v31, %v3858_v54 }
 0x23c   : > { %v3861_v17 = vpop.f32.mrf.mxu1 }
 0x23d   : > { %v2948_v47 = vadd.f32 %v3860_v6, %v5650_v42 }
 0x23e   : > { %v3862_v38 = vpop.f32.mrf.mxu1 }
 0x23f   : > { %v3863_v46 = vadd.f32 %v3862_v38, %v3861_v17 }
 0x240   : > { %v5643_v63 = vpop.f32.mrf.mxu1 }
 0x241   : > { %v2953_v3 = vadd.f32 %v3863_v46, %v5650_v42 }
 0x242   : > { %v5645_v1 = vpop.f32.mrf.mxu1 }
 0x243   : > { %v3866_v54 = vadd.f32 %v5645_v1, %v5643_v63 }
 0x244   : > { %v3867_v4 = vpop.f32.mrf.mxu1 }
 0x245   : > { %v2956_v17 = vadd.f32 %v3866_v54, %v5650_v42 }
 0x246   : > { %v3868_v19 = vpop.f32.mrf.mxu1 }
 0x247   : > { %v3869_v23 = vadd.f32 %v3868_v19, %v3867_v4 }
 0x248   : > { %v3870_v22 = vpop.f32.mrf.mxu1 }
 0x24a   : > { %v3871_v11 = vpop.f32.mrf.mxu1 }
 0x24b   : > { %v3872_v24 = vadd.f32 %v3871_v11, %v3870_v22 }
 0x24c   : > { %v3873_v41 = vpop.f32.mrf.mxu1 }
 0x24d   : > { %v2964_v25 = vadd.f32 %v3872_v24, %v5650_v42 }
 0x24e   : > { %v3874_v37 = vpop.f32.mrf.mxu1 }
 0x250   : > { %v3876_v60 = vpop.f32.mrf.mxu1 }
 0x252   : > { %v3877_v53 = vpop.f32.mrf.mxu1 }
 0x254   : > { %v3879_v59 = vpop.f32.mrf.mxu1 }
 0x256   : > { %v3880_v36 = vpop.f32.mrf.mxu1 }
 0x258   : > { %v3882_v19 = vpop.f32.mrf.mxu1 }
 0x2a5   : > { %v3967_v34 = vpop.f32.mrf.mxu0 }
 0x2a6   : > { %v3026_v50 = vadd.f32 %v3967_v34, %v2929_v32  ;;  %v2961_v34 = vadd.f32 %v3869_v23, %v5650_v42 }
 0x2a7   : > { %v3017_v40 = vpop.f32.mrf.mxu0 }
 0x2a8   : > { %v3018_v8 = vadd.f32 %v3017_v40, %v2921_v9  ;;  %v3082_v26 = vmax.f32 %v3026_v50, 0.0  ;;  %v3875_v50 = vadd.f32 %v3874_v37, %v3873_v41 }
 0x2a9   : > { %v3968_v12 = vpop.f32.mrf.mxu0 }
 0x2aa   : > { %v3029_v27 = vadd.f32 %v3968_v12, %v2932_v55  ;;  %v3080_v14 = vmax.f32 %v3018_v8, 0.0 }
 0x2ab   : > { %v3020_v43 = vpop.f32.mrf.mxu0 }
 0x2ac   : > { %v3021_v30 = vadd.f32 %v3020_v43, %v2924_v51  ;;  %v3083_v18 = vmax.f32 %v3029_v27, 0.0  ;;  %v3883_v27 = vpop.f32.mrf.mxu1 }
 0x2ad   : > { %v3884_v43 = vadd.f32 %v3883_v27, %v3882_v19 }
 0x2ae   : > { %v3081_v13 = vmax.f32 %v3021_v30, 0.0  ;;  %v3097_v49 = vpack.c.bf16 %v3083_v18, %v3082_v26  ;;  %v3881_v30 = vadd.f32 %v3880_v36, %v3879_v59  ;;  %v3878_v18 = vadd.f32 %v3877_v53, %v3876_v60 }
 0x2af   : > { %v2980_v26 = vadd.f32 %v3884_v43, %v5650_v42 }
 0x2b0   : > { %v3096_v39 = vpack.c.bf16 %v3081_v13, %v3080_v14  ;;  %v2969_v13 = vadd.f32 %v3875_v50, %v5650_v42  ;;  %v2972_v6 = vadd.f32 %v3878_v18, %v5650_v42 }
 0x2b2   : > { %3997 = vmatprep.mubr.bf16.mxu0 %v3096_v39  ;;  %v2977_v39 = vadd.f32 %v3881_v30, %v5650_v42 }
 0x2b3   : > { %3998 = vmatmul.mubr.bf16.vlgmr.msra.gmra.mxu0 %v3097_v49 }
 0x2b5   : > { %v3971_v28 = vpop.f32.mrf.mxu0 }
 0x2b6   : > { %v3042_v35 = vadd.f32 %v3971_v28, %v2945_v56 }
 0x2b7   : > { %v3033_v29 = vpop.f32.mrf.mxu0 }
 0x2b8   : > { %v3034_v15 = vadd.f32 %v3033_v29, %v2937_v5  ;;  %v3086_v21 = vmax.f32 %v3042_v35, 0.0 }
 0x2b9   : > { %v3972_v44 = vpop.f32.mrf.mxu0 }
 0x2ba   : > { %v3045_v62 = vadd.f32 %v3972_v44, %v2948_v47  ;;  %v3084_v16 = vmax.f32 %v3034_v15, 0.0  ;;  %v3602_v44 = vld [vmem:[%s5704_s6] ss:$0 sm:$0xff] }
 0x2bb   : > { %v3036_v45 = vpop.f32.mrf.mxu0 }
 0x2bc   : > { %v3037_v52 = vadd.f32 %v3036_v45, %v2940_v57  ;;  %v3087_v20 = vmax.f32 %v3045_v62, 0.0 }
 0x2be   : > { %v3085_v58 = vmax.f32 %v3037_v52, 0.0  ;;  %v3099_v2 = vpack.c.bf16 %v3087_v20, %v3086_v21 }
 0x2c0   : > { %v3098_v61 = vpack.c.bf16 %v3085_v58, %v3084_v16 }
 0x2c2   : > { %4001 = vmatprep.mubr.bf16.mxu0 %v3098_v61 }
 0x2c3   : > { %4002 = vmatmul.mubr.bf16.gmra.mxu0 %v3099_v2 }
 0x2c5   : > { %v3975_v7 = vpop.f32.mrf.mxu0 }
 0x2c6   : > { %v3058_v38 = vadd.f32 %v3975_v7, %v2961_v34 }
 0x2c7   : > { %v3049_v31 = vpop.f32.mrf.mxu0 }
 0x2c8   : > { %v3050_v40 = vadd.f32 %v3049_v31, %v2953_v3  ;;  %v3090_v1 = vmax.f32 %v3058_v38, 0.0 }
 0x2c9   : > { %v3976_v48 = vpop.f32.mrf.mxu0 }
 0x2ca   : > { %v3061_v9 = vadd.f32 %v3976_v48, %v2964_v25  ;;  %v3088_v12 = vmax.f32 %v3050_v40, 0.0 }
 0x2cb   : > { %v3052_v4 = vpop.f32.mrf.mxu0 }
 0x2cc   : > { %v3053_v55 = vadd.f32 %v3052_v4, %v2956_v17  ;;  %v3091_v32 = vmax.f32 %v3061_v9, 0.0 }
 0x2ce   : > { %v3089_v63 = vmax.f32 %v3053_v55, 0.0  ;;  %v3101_v51 = vpack.c.bf16 %v3091_v32, %v3090_v1 }
 0x2d0   : > { %v3100_v8 = vpack.c.bf16 %v3089_v63, %v3088_v12 }
 0x2d2   : > { %4005 = vmatprep.mubr.bf16.mxu1 %v3100_v8 }
 0x2d3   : > { %4006 = vmatmul.mubr.bf16.vlgmr.msra.gmra.mxu1 %v3101_v51 }
 0x2d5   : > { %v3979_v22 = vpop.f32.mrf.mxu0 }
 0x2d6   : > { %v3074_v33 = vadd.f32 %v3979_v22, %v2977_v39 }
 0x2d7   : > { %v3065_v14 = vpop.f32.mrf.mxu0 }
 0x2d8   : > { %v3066_v49 = vadd.f32 %v3065_v14, %v2969_v13  ;;  %v3094_v47 = vmax.f32 %v3074_v33, 0.0 }
 0x2d9   : > { %v3980_v11 = vpop.f32.mrf.mxu0 }
 0x2da   : > { %v3077_v0 = vadd.f32 %v3980_v11, %v2980_v26  ;;  %v3092_v29 = vmax.f32 %v3066_v49, 0.0 }
 0x2db   : > { %v3068_v28 = vpop.f32.mrf.mxu0 }
 0x2dc   : > { %v3069_v41 = vadd.f32 %v3068_v28, %v2972_v6  ;;  %v3095_v10 = vmax.f32 %v3077_v0, 0.0 }
 0x2de   : > { %v3093_v5 = vmax.f32 %v3069_v41, 0.0  ;;  %v3103_v56 = vpack.c.bf16 %v3095_v10, %v3094_v47 }
 0x2e0   : > { %v3102_v37 = vpack.c.bf16 %v3093_v5, %v3092_v29 }
 0x2e2   : > { %4009 = vmatprep.mubr.bf16.mxu1 %v3102_v37 }
 0x2e3   : > { %4010 = vmatmul.mubr.bf16.gmra.mxu1 %v3103_v56 }
 0x373   : > { %v3999_v42 = vpop.f32.mrf.mxu0 }
 0x374   : > { %v3218_v15 = vadd.f32 %v3999_v42, %v3602_v44 }
 0x375   : > { %v3209_v62 = vpop.f32.mrf.mxu0 }
 0x376   : > { %3274 = vst [vmem:[%s5677_s30 + $0x10] sm:$0xff] %v3218_v15  ;;  %v3210_v57 = vadd.f32 %v3602_v44, %v3209_v62 }
 0x377   : > { %v4000_v35 = vpop.f32.mrf.mxu0 }
 0x378   : > { %3272 = vst [vmem:[%s5677_s30] sm:$0xff] %v3210_v57  ;;  %v3221_v45 = vadd.f32 %v4000_v35, %v3602_v44 }
 0x379   : > { %v3212_v52 = vpop.f32.mrf.mxu0 }
 0x37a   : > { %3275 = vst [vmem:[%s5677_s30 + $0x18] sm:$0xff] %v3221_v45  ;;  %v3213_v60 = vadd.f32 %v3602_v44, %v3212_v52 }
 0x37c   : > { %3273 = vst [vmem:[%s5677_s30 + $0x8] sm:$0xff] %v3213_v60 }
 0x383   : > { %v4003_v20 = vpop.f32.mrf.mxu0 }
 0x384   : > { %v3234_v16 = vadd.f32 %v4003_v20, %v3602_v44 }
 0x385   : > { %v3225_v58 = vpop.f32.mrf.mxu0 }
 0x386   : > { %3278 = vst [vmem:[%s5677_s30 + $0x30] sm:$0xff] %v3234_v16  ;;  %v3226_v21 = vadd.f32 %v3602_v44, %v3225_v58 }
 0x387   : > { %v4004_v61 = vpop.f32.mrf.mxu0 }
 0x388   : > { %3276 = vst [vmem:[%s5677_s30 + $0x20] sm:$0xff] %v3226_v21  ;;  %v3237_v53 = vadd.f32 %v4004_v61, %v3602_v44 }
 0x389   : > { %v3228_v2 = vpop.f32.mrf.mxu0 }
 0x38a   : > { %3279 = vst [vmem:[%s5677_s30 + $0x38] sm:$0xff] %v3237_v53  ;;  %v3229_v46 = vadd.f32 %v3602_v44, %v3228_v2 }
 0x38c   : > { %3277 = vst [vmem:[%s5677_s30 + $0x28] sm:$0xff] %v3229_v46 }
 0x393   : > { %v4007_v24 = vpop.f32.mrf.mxu1 }
 0x394   : > { %v3250_v23 = vadd.f32 %v4007_v24, %v3602_v44 }
 0x395   : > { %v3241_v59 = vpop.f32.mrf.mxu1 }
 0x396   : > { %3282 = vst [vmem:[%s5677_s30 + $0x50] sm:$0xff] %v3250_v23  ;;  %v3242_v7 = vadd.f32 %v3602_v44, %v3241_v59 }
 0x397   : > { %v4008_v54 = vpop.f32.mrf.mxu1 }
 0x398   : > { %3280 = vst [vmem:[%s5677_s30 + $0x40] sm:$0xff] %v3242_v7  ;;  %v3253_v31 = vadd.f32 %v4008_v54, %v3602_v44 }
 0x399   : > { %v3244_v3 = vpop.f32.mrf.mxu1 }
 0x39a   : > { %3283 = vst [vmem:[%s5677_s30 + $0x58] sm:$0xff] %v3253_v31  ;;  %v3245_v25 = vadd.f32 %v3602_v44, %v3244_v3 }
 0x39c   : > { %3281 = vst [vmem:[%s5677_s30 + $0x48] sm:$0xff] %v3245_v25 }
 0x3a3   : > { %v4011_v36 = vpop.f32.mrf.mxu1 }
 0x3a4   : > { %v3266_v34 = vadd.f32 %v4011_v36, %v3602_v44 }
 0x3a5   : > { %v3257_v48 = vpop.f32.mrf.mxu1 }
 0x3a6   : > { %3286 = vst [vmem:[%s5677_s30 + $0x70] sm:$0xff] %v3266_v34  ;;  %v3258_v40 = vadd.f32 %v3602_v44, %v3257_v48 }
 0x3a7   : > { %v4012_v9 = vpop.f32.mrf.mxu1 }
 0x3a8   : > { %3284 = vst [vmem:[%s5677_s30 + $0x60] sm:$0xff] %v3258_v40  ;;  %v3269_v17 = vadd.f32 %v4012_v9, %v3602_v44 }
 0x3a9   : > { %v3260_v38 = vpop.f32.mrf.mxu1 }
 0x3aa   : > { %3287 = vst [vmem:[%s5677_s30 + $0x78] sm:$0xff] %v3269_v17  ;;  %v3261_v4 = vadd.f32 %v3602_v44, %v3260_v38 }
 0x3ac   : > { %3285 = vst [vmem:[%s5677_s30 + $0x68] sm:$0xff] %v3261_v4 }
 0x3ad PF: > { %s17_s24 = sadd.s32 1, %s4393_s24  }
 0x3ae   : > { %p14_p4 = scmp.ge.s32.totalorder %s17_s24, 4  }
 0x3b0   :  { %16 = sbr.rel (!%p14_p4) target bundleno = 1 (0x1), region = 78 }

</bundles_post_ra>
